<compile_context>
chip_gen: v7x
topology: tpu7x:2x2x1
jax: 0.10.0
libtpu: 0.0.40
codegen_flags: <defaults>
</compile_context>

<pallas_src>
import functools

import numpy as np
import jax
import jax.numpy as jnp
from jax.experimental import pallas as pl
from jax.experimental.pallas import tpu as pltpu

BN_EPS = 1e-5
PACK_W = 128          # lane width of the packed parameter / activation / output slabs
NEG_PAD = -1e9        # bias for padded logit columns -> zero softmax mass (finite after /tau)


def _round_up(x, m):
  return (x + m - 1) // m * m


def _bn_train(x):
  # nn.BatchNorm1d (training): batch mean, biased variance, gamma=1, beta=0.
  # Single fused cross-sublane reduce: mean over concat([x, x^2]) then split.
  n = x.shape[-1]
  s = jnp.mean(jnp.concatenate([x, x * x], axis=-1), axis=0, keepdims=True)
  mean, ex2 = s[:, :n], s[:, n:]
  var = jnp.maximum(ex2 - mean * mean, 0.0)
  return (x - mean) * jax.lax.rsqrt(var + BN_EPS)


def _softmax_last(x):
  x = x - jnp.max(x, axis=-1, keepdims=True)
  e = jnp.exp(x)
  return e / jnp.sum(e, axis=-1, keepdims=True)


# -----------------------------------------------------------------------------
# Parameter / input packing (plain JAX, wrapper side)
# -----------------------------------------------------------------------------
def _pack(entries, dtype, align):
  """Pack a list of (name, 2-D array) into one [rows, PACK_W] slab.

  Each block's row offset (and the slab total) is rounded up to `align` rows
  (16 for bf16, 8 for f32) so static in-kernel slices never straddle a vreg
  tile boundary.  Returns (slab, offsets) with offsets[name] = (row, rows,
  cols) as static Python ints.
  """
  offsets, blocks, r = {}, [], 0
  for name, a in entries:
    a = jnp.asarray(a, dtype)
    rr, cc = a.shape
    if cc < PACK_W:
      a = jnp.concatenate([a, jnp.zeros((rr, PACK_W - cc), dtype)], axis=1)
    pad = _round_up(r, align) - r
    if pad:
      blocks.append(jnp.zeros((pad, PACK_W), dtype))
      r += pad
    offsets[name] = (r, rr, cc)
    blocks.append(a)
    r += rr
  pad = _round_up(r, align) - r
  if pad:
    blocks.append(jnp.zeros((pad, PACK_W), dtype))
  return jnp.concatenate(blocks, axis=0), offsets


def _preprocess(data, sp_send, sp_rec, sp_rec_t, gumbel, P, *, C, D, H, K, MH, MO):
  """Shared preprocessing for the kernel wrapper and the pure-JAX reference."""
  f32, bf16 = jnp.float32, jnp.bfloat16
  send_idx = jnp.argmax(sp_send, axis=1).astype(jnp.int32)
  rec_idx = jnp.argmax(sp_rec, axis=1).astype(jnp.int32)
  sd = jnp.take(data, send_idx, axis=0)
  rd = jnp.take(data, rec_idx, axis=0)
  pre = dict(
      data=data.astype(f32),
      # lane-concatenated one-hots: [sps | spr] -> [E, 2C] (fused gather matmul)
      sps_spr=jnp.concatenate([sp_send, sp_rec], axis=1).astype(bf16),
      sprt=(sp_rec_t * (1.0 / C)).astype(bf16),         # 1/C folded into agg
      gumbel=gumbel.astype(f32),
      # lane-concatenated decoder gathers: [sd | rd] -> [E, 2D]
      sdrd=jnp.concatenate([sd, rd], axis=1).astype(bf16),
      send_idx=send_idx, rec_idx=rec_idx,
  )
  pre.update(
      e1w1=P["e1w1"], e1b1=P["e1b1"], e1w2=P["e1w2"], e1b2=P["e1b2"],
      # fuse the send/recv halves of fc1: one [H, 2H] weight producing [ys|yr]
      e2w1sr=jnp.concatenate([P["e2w1"][:H], P["e2w1"][H:]], axis=1),
      e2b1=P["e2b1"], e2w2=P["e2w2"], e2b2=P["e2b2"],
      e3w1=P["e3w1"], e3b1=P["e3b1"], e3w2=P["e3w2"], e3b2=P["e3b2"],
      e4w1sr=jnp.concatenate([P["e4w1"][:H], P["e4w1"][H:2 * H]], axis=1),
      e4w1k=P["e4w1"][2 * H:],
      e4b1=P["e4b1"], e4w2=P["e4w2"], e4b2=P["e4b2"],
      eow=P["eow"], eob=P["eob"],
      dw1=P["dw1"], db1=P["db1"], dw2=P["dw2"], db2=P["db2"],
      dw3=P["dw3"], db3=P["db3"],
  )
  # Fuse the K per-edge-type message MLPs:
  #   fc1: concat over K along the output axis; full [2D, K*MH] (send rows on
  #        top, recv rows below) so it matches the lane-concatenated [sd|rd].
  #   fc2: block-diagonal [K*MH, K*MO].
  m1sr = jnp.concatenate([P["mw1"][k] for k in range(K)], axis=1)
  mb1 = jnp.concatenate([P["mb1"][k] for k in range(K)], axis=1)
  m2 = jnp.zeros((K * MH, K * MO), f32)
  for k in range(K):
    m2 = m2.at[k * MH:(k + 1) * MH, k * MO:(k + 1) * MO].set(P["mw2"][k])
  mb2 = jnp.concatenate([P["mb2"][k] for k in range(K)], axis=1)
  pre.update(m1sr=m1sr, mb1=mb1, m2bd=m2, mb2=mb2)
  return pre


# -----------------------------------------------------------------------------
# Pallas kernel: whole VAE forward in one program (everything fits in VMEM).
# -----------------------------------------------------------------------------
def _vae_kernel(a_ref, f_ref, w_ref, b_ref, out_ref, *,
                C, D, E, H, K, MO, tau, aoff, foff, woff, boff):
  f32, bf16 = jnp.float32, jnp.bfloat16

  def _view(ref, off, name):         # static slice of a packed slab (zero cost)
    r, rr, cc = off[name]
    return ref[r:r + rr, 0:cc]

  W = lambda n: _view(w_ref, woff, n)     # bf16 weights
  B = lambda n: _view(b_ref, boff, n)     # f32 biases
  A = lambda n: _view(a_ref, aoff, n)     # bf16 activations / one-hots
  G = lambda n: _view(f_ref, foff, n)     # f32 data / gumbel

  def dot(a, b):                     # bf16 MXU matmul, f32 accumulation
    return jnp.dot(a.astype(bf16), b.astype(bf16), preferred_element_type=f32)

  def softmax(x):                    # f32 softmax; denom via EUP approx recip
    x = x - jnp.max(x, axis=-1, keepdims=True)
    e = jnp.exp(x)
    return e * pl.reciprocal(jnp.sum(e, axis=-1, keepdims=True), approx=True)

  def split_stack(y):                # [C, 2H] -> [2C, H] (matches [sps|spr])
    return jnp.concatenate([y[:, :H], y[:, H:2 * H]], axis=0)

  data = G("data")                   # [C, D]  f32
  gum = G("gum")                     # [E, 128] f32 (pad columns are zero)
  sps_spr = A("sps_spr")             # [E, 2C] bf16 one-hot [send | recv]
  sdrd = A("sdrd")                   # [E, 2D] bf16 gathered data [send | recv]
  sprt = A("sprt")                   # [C, E]  bf16, pre-scaled by 1/C

  # ---------------- Encoder (factor-graph MLP encoder) ----------------------
  h = jnp.maximum(dot(data, W("e1w1")) + B("e1b1"), 0.0)
  h = jnp.maximum(dot(h, W("e1w2")) + B("e1b2"), 0.0)
  x = _bn_train(h)                                              # [C, H]

  # node2edge + mlp2(fc1): one [H,2H] matmul, then one fused gather matmul.
  ysr = split_stack(dot(x, W("e2w1sr")))                        # [2C, H]
  h = jnp.maximum(dot(sps_spr, ysr) + B("e2b1"), 0.0)           # [E, H]
  h = jnp.maximum(dot(h, W("e2w2")) + B("e2b2"), 0.0)
  x = _bn_train(h)                                              # [E, H]
  x_skip = x

  xn = dot(sprt, x)                                             # edge2node /C
  h = jnp.maximum(dot(xn, W("e3w1")) + B("e3b1"), 0.0)
  h = jnp.maximum(dot(h, W("e3w2")) + B("e3b2"), 0.0)
  xn = _bn_train(h)                                             # [C, H]

  ysr = split_stack(dot(xn, W("e4w1sr")))                       # [2C, H]
  h = dot(sps_spr, ysr) + dot(x_skip, W("e4w1k")) + B("e4b1")
  h = jnp.maximum(h, 0.0)
  h = jnp.maximum(dot(h, W("e4w2")) + B("e4b2"), 0.0)
  x = _bn_train(h)                                              # [E, H]

  # Logits are 128 lanes wide (eow zero-padded, eob pad = -1e9) so padded
  # columns get exactly zero softmax mass and stores stay unmasked.
  logits = dot(x, W("eow")) + B("eob")                          # [E, 128]
  edges = softmax((logits + gum) * (1.0 / tau))                 # [E, 128]
  prob = softmax(logits)                                        # [E, 128]

  # ---------------- Decoder -------------------------------------------------
  m = jnp.tanh(dot(sdrd, W("m1sr")) + B("mb1"))                 # [E, K*MH]
  m = jnp.tanh(dot(m, W("m2bd")) + B("mb2"))                    # [E, K*MO]
  ew = edges * (1.0 / K)                                        # hoisted 1/K
  all_msgs = m[:, 0:MO] * ew[:, 0:1]
  for k in range(1, K):                                         # static unroll
    all_msgs = all_msgs + m[:, k * MO:(k + 1) * MO] * ew[:, k:k + 1]
  agg = dot(sprt, all_msgs)                                     # [C, MO] (/C folded)
  p = jnp.maximum(dot(agg, W("dw1")) + B("db1"), 0.0)
  p = jnp.maximum(dot(p, W("dw2")) + B("db2"), 0.0)
  out_nodes = dot(p, W("dw3")) + B("db3")                       # [C, 128] (dw3 padded)

  # Direct lane-dense sub-slice stores (no in-kernel concatenate); row
  # offsets 0 / E / 2E / 2E+C are multiples of 8 for the fully-connected graph.
  out_ref[0:E, :] = edges
  out_ref[E:2 * E, :] = prob
  out_ref[2 * E:2 * E + C, :] = out_nodes
  if out_ref.shape[0] > 2 * E + C:
    out_ref[2 * E + C:, :] = jnp.zeros(
        (out_ref.shape[0] - (2 * E + C), PACK_W), f32)


# -----------------------------------------------------------------------------
# Wrapper
# -----------------------------------------------------------------------------
def vae_forward(data, sp_send, sp_rec, sp_send_t, sp_rec_t, gumbel, params, *,
                concept_num, input_dim, hidden_dim, msg_hidden_dim,
                msg_output_dim, edge_type_num, tau):
  del sp_send_t  # only needed for the graph scatter; indices come from sp_send
  C, D, H = concept_num, input_dim, hidden_dim
  K, MH, MO = edge_type_num, msg_hidden_dim, msg_output_dim
  E = sp_send.shape[0]
  f32, bf16 = jnp.float32, jnp.bfloat16

  pre = _preprocess(data, sp_send, sp_rec, sp_rec_t, gumbel, params,
                    C=C, D=D, H=H, K=K, MH=MH, MO=MO)

  # Lane-dense output trick: pad the final-layer weights to 128 output columns.
  eow_p = jnp.concatenate([pre["eow"], jnp.zeros((H, PACK_W - K), f32)], axis=1)
  eob_p = jnp.concatenate([pre["eob"], jnp.full((1, PACK_W - K), NEG_PAD, f32)],
                          axis=1)
  dw3_p = jnp.concatenate([pre["dw3"], jnp.zeros((H, PACK_W - D), f32)], axis=1)
  db3_p = jnp.concatenate([pre["db3"], jnp.zeros((1, PACK_W - D), f32)], axis=1)
  gum_p = jnp.concatenate([pre["gumbel"], jnp.zeros((E, PACK_W - K), f32)],
                          axis=1)

  # Four input slabs -> four DMAs total.
  w_entries = [(n, pre[n]) for n in (
      "e1w1", "e1w2", "e2w1sr", "e2w2", "e3w1", "e3w2",
      "e4w1sr", "e4w1k", "e4w2", "m1sr", "m2bd", "dw1", "dw2",
  )] + [("eow", eow_p), ("dw3", dw3_p)]
  b_entries = [(n, pre[n]) for n in (
      "e1b1", "e1b2", "e2b1", "e2b2", "e3b1", "e3b2", "e4b1", "e4b2",
      "mb1", "mb2", "db1", "db2",
  )] + [("eob", eob_p), ("db3", db3_p)]
  a_entries = [("sps_spr", pre["sps_spr"]), ("sdrd", pre["sdrd"]),
               ("sprt", pre["sprt"])]
  f_entries = [("data", pre["data"]), ("gum", gum_p)]

  wbuf, woff = _pack(w_entries, bf16, 16)   # bf16 weights: 16-row aligned
  bbuf, boff = _pack(b_entries, f32, 8)     # f32 biases:   8-row aligned
  abuf, aoff = _pack(a_entries, bf16, 16)   # bf16 activations / one-hots
  fbuf, foff = _pack(f_entries, f32, 8)     # f32 data + gumbel

  rows = _round_up(2 * E + C, 8)
  kernel = functools.partial(_vae_kernel, C=C, D=D, E=E, H=H, K=K, MO=MO,
                             tau=tau, aoff=aoff, foff=foff, woff=woff,
                             boff=boff)
  vmem = lambda: pl.BlockSpec(memory_space=pltpu.MemorySpace.VMEM)
  inputs = (abuf, fbuf, wbuf, bbuf)
  slab = pl.pallas_call(
      kernel,
      out_shape=jax.ShapeDtypeStruct((rows, PACK_W), f32),
      in_specs=[vmem() for _ in inputs],
      out_specs=vmem(),
  )(*inputs)

  edges = slab[:E, :K]
  prob = slab[E:2 * E, :K]
  output = slab[2 * E:2 * E + C, :D]

  # Latent-graph scatter (index_put) with integer indices in plain JAX.
  graphs = jnp.zeros((K, C, C), f32)
  for k in range(K):
    graphs = graphs.at[k, pre["send_idx"], pre["rec_idx"]].set(edges[:, k])
  # TODO(synk): the in-place update of the non-trainable self.graphs.data
  # buffer (a stateful side effect) is not reproduced; the returned `graphs`
  # output carries the same values.
  return graphs, output, prob


# -----------------------------------------------------------------------------
# Deterministic parameter init (synthetic; shapes match the torch module)
# -----------------------------------------------------------------------------
PARAM_ORDER = (
    "e1w1", "e1b1", "e1w2", "e1b2", "e2w1", "e2b1", "e2w2", "e2b2",
    "e3w1", "e3b1", "e3w2", "e3b2", "e4w1", "e4b1", "e4w2", "e4b2",
    "eow", "eob",
    "mw1", "mb1", "mw2", "mb2",
    "dw1", "db1", "dw2", "db2", "dw3", "db3",
)


def init_params(key, D, H, K, MH, MO):
  shapes = {
      "e1w1": (D, H), "e1b1": (1, H), "e1w2": (H, H), "e1b2": (1, H),
      "e2w1": (2 * H, H), "e2b1": (1, H), "e2w2": (H, H), "e2b2": (1, H),
      "e3w1": (H, H), "e3b1": (1, H), "e3w2": (H, H), "e3b2": (1, H),
      "e4w1": (3 * H, H), "e4b1": (1, H), "e4w2": (H, H), "e4b2": (1, H),
      "eow": (H, K), "eob": (1, K),
      "mw1": (K, 2 * D, MH), "mb1": (K, 1, MH),
      "mw2": (K, MH, MO), "mb2": (K, 1, MO),
      "dw1": (MO, H), "db1": (1, H),
      "dw2": (H, H), "db2": (1, H),
      "dw3": (H, D), "db3": (1, D),
  }
  params = {}
  keys = jax.random.split(key, len(PARAM_ORDER))
  for k, name in zip(keys, PARAM_ORDER):
    scale = 0.1 if "w" in name else 0.01       # weights 0.1, biases 0.01
    params[name] = scale * jax.random.normal(k, shapes[name], jnp.float32)
  return params


# -----------------------------------------------------------------------------
# Pure-JAX reference (same fused math / same bf16 operand casts)
# -----------------------------------------------------------------------------
def vae_reference(data, sp_send, sp_rec, sp_send_t, sp_rec_t, gumbel, params, *,
                  concept_num, input_dim, hidden_dim, msg_hidden_dim,
                  msg_output_dim, edge_type_num, tau):
  del sp_send_t
  C, D, H = concept_num, input_dim, hidden_dim
  K, MH, MO = edge_type_num, msg_hidden_dim, msg_output_dim
  pre = _preprocess(data, sp_send, sp_rec, sp_rec_t, gumbel, params,
                    C=C, D=D, H=H, K=K, MH=MH, MO=MO)
  f32, bf16 = jnp.float32, jnp.bfloat16
  dot = lambda a, b: jnp.dot(a.astype(bf16), b.astype(bf16),
                             preferred_element_type=f32)
  split_stack = lambda y: jnp.concatenate([y[:, :H], y[:, H:2 * H]], axis=0)

  h = jnp.maximum(dot(pre["data"], pre["e1w1"]) + pre["e1b1"], 0.0)
  h = jnp.maximum(dot(h, pre["e1w2"]) + pre["e1b2"], 0.0)
  x = _bn_train(h)
  ysr = split_stack(dot(x, pre["e2w1sr"]))
  h = jnp.maximum(dot(pre["sps_spr"], ysr) + pre["e2b1"], 0.0)
  h = jnp.maximum(dot(h, pre["e2w2"]) + pre["e2b2"], 0.0)
  x = _bn_train(h)
  x_skip = x
  xn = dot(pre["sprt"], x)
  h = jnp.maximum(dot(xn, pre["e3w1"]) + pre["e3b1"], 0.0)
  h = jnp.maximum(dot(h, pre["e3w2"]) + pre["e3b2"], 0.0)
  xn = _bn_train(h)
  ysr = split_stack(dot(xn, pre["e4w1sr"]))
  h = dot(pre["sps_spr"], ysr) + dot(x_skip, pre["e4w1k"]) + pre["e4b1"]
  h = jnp.maximum(h, 0.0)
  h = jnp.maximum(dot(h, pre["e4w2"]) + pre["e4b2"], 0.0)
  x = _bn_train(h)
  logits = dot(x, pre["eow"]) + pre["eob"]
  edges = _softmax_last((logits + pre["gumbel"]) * (1.0 / tau))
  prob = _softmax_last(logits)

  m = jnp.tanh(dot(pre["sdrd"], pre["m1sr"]) + pre["mb1"])
  m = jnp.tanh(dot(m, pre["m2bd"]) + pre["mb2"])
  ew = edges * (1.0 / K)
  all_msgs = m[:, 0:MO] * ew[:, 0:1]
  for k in range(1, K):
    all_msgs = all_msgs + m[:, k * MO:(k + 1) * MO] * ew[:, k:k + 1]
  agg = dot(pre["sprt"], all_msgs)
  p = jnp.maximum(dot(agg, pre["dw1"]) + pre["db1"], 0.0)
  p = jnp.maximum(dot(p, pre["dw2"]) + pre["db2"], 0.0)
  output = dot(p, pre["dw3"]) + pre["db3"]

  graphs = jnp.zeros((K, C, C), f32)
  for k in range(K):
    graphs = graphs.at[k, pre["send_idx"], pre["rec_idx"]].set(edges[:, k])
  return graphs, output, prob


if __name__ == "__main__":
  # Small shapes consistent with the module.
  C = 8      # concept_num
  D = 16     # input_dim (concept embedding dim)
  H = 16     # hidden_dim
  K = 2      # edge_type_num (== encoder output_dim)
  MH = 16    # msg_hidden_dim
  MO = 16    # msg_output_dim
  TAU = 0.1
  E = C * (C - 1)  # fully-connected directed graph w/o self loops -> 56 edges

  key = jax.random.PRNGKey(0)
  k_data, k_noise, k_par = jax.random.split(key, 3)

  data = jax.random.normal(k_data, (C, D), jnp.float32)

  send_idx, rec_idx = [], []
  for i in range(C):
    for j in range(C):
      if i != j:
        send_idx.append(i)
        rec_idx.append(j)
  sp_send = jax.nn.one_hot(jnp.array(send_idx), C, dtype=jnp.float32)   # [E, C]
  sp_rec = jax.nn.one_hot(jnp.array(rec_idx), C, dtype=jnp.float32)     # [E, C]
  sp_send_t = sp_send.T                                                 # [C, E]
  sp_rec_t = sp_rec.T                                                   # [C, E]

  u = jax.random.uniform(k_noise, (E, K), jnp.float32,
                         minval=1e-6, maxval=1.0 - 1e-6)
  gumbel = -jnp.log(-jnp.log(u))                                        # Gumbel(0,1)

  params = init_params(k_par, D, H, K, MH, MO)

  hp = dict(concept_num=C, input_dim=D, hidden_dim=H, msg_hidden_dim=MH,
            msg_output_dim=MO, edge_type_num=K, tau=TAU)

  graphs, output, prob = jax.block_until_ready(
      vae_forward(data, sp_send, sp_rec, sp_send_t, sp_rec_t, gumbel, params,
                  **hp))

  g_ref, o_ref, p_ref = vae_reference(
      data, sp_send, sp_rec, sp_send_t, sp_rec_t, gumbel, params, **hp)

  np.testing.assert_allclose(np.asarray(graphs), np.asarray(g_ref),
                             rtol=2e-2, atol=2e-2)
  np.testing.assert_allclose(np.asarray(output), np.asarray(o_ref),
                             rtol=2e-2, atol=2e-2)
  np.testing.assert_allclose(np.asarray(prob), np.asarray(p_ref),
                             rtol=2e-2, atol=2e-2)

  print("KERNEL_OK")
</pallas_src>

<mosaic_0001>
module attributes {stable_mosaic.version = 11 : i64} {
  func.func @_vae_kernel(%arg0: memref<144x128xbf16, #tpu.memory_space<vmem>>, %arg1: memref<64x128xf32, #tpu.memory_space<vmem>>, %arg2: memref<272x128xbf16, #tpu.memory_space<vmem>>, %arg3: memref<112x128xf32, #tpu.memory_space<vmem>>, %arg4: memref<120x128xf32, #tpu.memory_space<vmem>>) attributes {dimension_semantics = [], scalar_prefetch = 0 : i64, scratch_operands = 0 : i64, tpu.core_type = #tpu.core_type<tc>} {
    %c0 = arith.constant 0 : index
    %c0_0 = arith.constant 0 : index
    %0 = vector.load %arg1[%c0, %c0_0] : memref<64x128xf32, #tpu.memory_space<vmem>>, vector<8x16xf32>
    %c8 = arith.constant 8 : index
    %c0_1 = arith.constant 0 : index
    %1 = vector.load %arg1[%c8, %c0_1] : memref<64x128xf32, #tpu.memory_space<vmem>>, vector<56x128xf32>
    %c0_2 = arith.constant 0 : index
    %c0_3 = arith.constant 0 : index
    %2 = vector.load %arg0[%c0_2, %c0_3] : memref<144x128xbf16, #tpu.memory_space<vmem>>, vector<56x16xbf16>
    %c64 = arith.constant 64 : index
    %c0_4 = arith.constant 0 : index
    %3 = vector.load %arg0[%c64, %c0_4] : memref<144x128xbf16, #tpu.memory_space<vmem>>, vector<56x32xbf16>
    %c128 = arith.constant 128 : index
    %c0_5 = arith.constant 0 : index
    %4 = vector.load %arg0[%c128, %c0_5] : memref<144x128xbf16, #tpu.memory_space<vmem>>, vector<8x56xbf16>
    %c0_6 = arith.constant 0 : index
    %c0_7 = arith.constant 0 : index
    %5 = vector.load %arg2[%c0_6, %c0_7] : memref<272x128xbf16, #tpu.memory_space<vmem>>, vector<16x16xbf16>
    %6 = arith.truncf %0 : vector<8x16xf32> to vector<8x16xbf16>
    %cst = arith.constant dense<0.000000e+00> : vector<8x16xf32>
    %7 = tpu.matmul %6, %5, %cst {dimension_numbers = #tpu.dot_dimension_numbers<[1], [0], [0], [1], [0, 0, 1, 1], [], []>} : vector<8x16xbf16>, vector<16x16xbf16>, vector<8x16xf32> -> vector<8x16xf32>
    %c0_8 = arith.constant 0 : index
    %c0_9 = arith.constant 0 : index
    %8 = vector.load %arg3[%c0_8, %c0_9] : memref<112x128xf32, #tpu.memory_space<vmem>>, vector<1x16xf32>
    %9 = vector.broadcast %8 : vector<1x16xf32> to vector<8x16xf32>
    %10 = arith.addf %7, %9 : vector<8x16xf32>
    %cst_10 = arith.constant 0.000000e+00 : f32
    %11 = vector.broadcast %cst_10 : f32 to vector<8x16xf32>
    %12 = arith.maximumf %10, %11 : vector<8x16xf32>
    %c16 = arith.constant 16 : index
    %c0_11 = arith.constant 0 : index
    %13 = vector.load %arg2[%c16, %c0_11] : memref<272x128xbf16, #tpu.memory_space<vmem>>, vector<16x16xbf16>
    %14 = arith.truncf %12 : vector<8x16xf32> to vector<8x16xbf16>
    %cst_12 = arith.constant dense<0.000000e+00> : vector<8x16xf32>
    %15 = tpu.matmul %14, %13, %cst_12 {dimension_numbers = #tpu.dot_dimension_numbers<[1], [0], [0], [1], [0, 0, 1, 1], [], []>} : vector<8x16xbf16>, vector<16x16xbf16>, vector<8x16xf32> -> vector<8x16xf32>
    %c8_13 = arith.constant 8 : index
    %c0_14 = arith.constant 0 : index
    %16 = vector.load %arg3[%c8_13, %c0_14] : memref<112x128xf32, #tpu.memory_space<vmem>>, vector<1x16xf32>
    %17 = vector.broadcast %16 : vector<1x16xf32> to vector<8x16xf32>
    %18 = arith.addf %15, %17 : vector<8x16xf32>
    %cst_15 = arith.constant 0.000000e+00 : f32
    %19 = vector.broadcast %cst_15 : f32 to vector<8x16xf32>
    %20 = arith.maximumf %18, %19 : vector<8x16xf32>
    %21 = arith.mulf %20, %20 : vector<8x16xf32>
    %22 = tpu.concatenate %20, %21 in 1 : vector<8x16xf32>, vector<8x16xf32> -> vector<8x32xf32>
    %cst_16 = arith.constant dense<0.000000e+00> : vector<32xf32>
    %23 = vector.multi_reduction <add>, %22, %cst_16 [0] : vector<8x32xf32> to vector<32xf32>
    %24 = vector.shape_cast %23 : vector<32xf32> to vector<1x32xf32>
    %cst_17 = arith.constant 8.000000e+00 : f32
    %25 = vector.broadcast %cst_17 : f32 to vector<1x32xf32>
    %26 = arith.divf %24, %25 : vector<1x32xf32>
    %27 = vector.extract_strided_slice %26 {offsets = [0, 0], sizes = [1, 16], strides = [1, 1]} : vector<1x32xf32> to vector<1x16xf32>
    %28 = vector.extract_strided_slice %26 {offsets = [0, 16], sizes = [1, 16], strides = [1, 1]} : vector<1x32xf32> to vector<1x16xf32>
    %29 = arith.mulf %27, %27 : vector<1x16xf32>
    %30 = arith.subf %28, %29 : vector<1x16xf32>
    %cst_18 = arith.constant 0.000000e+00 : f32
    %31 = vector.broadcast %cst_18 : f32 to vector<1x16xf32>
    %32 = arith.maximumf %30, %31 : vector<1x16xf32>
    %33 = vector.broadcast %27 : vector<1x16xf32> to vector<8x16xf32>
    %34 = arith.subf %20, %33 : vector<8x16xf32>
    %cst_19 = arith.constant 9.99999974E-6 : f32
    %35 = vector.broadcast %cst_19 : f32 to vector<1x16xf32>
    %36 = arith.addf %32, %35 : vector<1x16xf32>
    %37 = math.rsqrt %36 : vector<1x16xf32>
    %38 = vector.broadcast %37 : vector<1x16xf32> to vector<8x16xf32>
    %39 = arith.mulf %34, %38 : vector<8x16xf32>
    %c32 = arith.constant 32 : index
    %c0_20 = arith.constant 0 : index
    %40 = vector.load %arg2[%c32, %c0_20] : memref<272x128xbf16, #tpu.memory_space<vmem>>, vector<16x32xbf16>
    %41 = arith.truncf %39 : vector<8x16xf32> to vector<8x16xbf16>
    %cst_21 = arith.constant dense<0.000000e+00> : vector<8x32xf32>
    %42 = tpu.matmul %41, %40, %cst_21 {dimension_numbers = #tpu.dot_dimension_numbers<[1], [0], [0], [1], [0, 0, 1, 1], [], []>} : vector<8x16xbf16>, vector<16x32xbf16>, vector<8x32xf32> -> vector<8x32xf32>
    %43 = vector.extract_strided_slice %42 {offsets = [0, 0], sizes = [8, 16], strides = [1, 1]} : vector<8x32xf32> to vector<8x16xf32>
    %44 = vector.extract_strided_slice %42 {offsets = [0, 16], sizes = [8, 16], strides = [1, 1]} : vector<8x32xf32> to vector<8x16xf32>
    %45 = tpu.concatenate %43, %44 in 0 : vector<8x16xf32>, vector<8x16xf32> -> vector<16x16xf32>
    %46 = arith.truncf %45 : vector<16x16xf32> to vector<16x16xbf16>
    %cst_22 = arith.constant dense<0.000000e+00> : vector<56x16xf32>
    %47 = tpu.matmul %2, %46, %cst_22 {dimension_numbers = #tpu.dot_dimension_numbers<[1], [0], [0], [1], [0, 0, 1, 1], [], []>} : vector<56x16xbf16>, vector<16x16xbf16>, vector<56x16xf32> -> vector<56x16xf32>
    %c16_23 = arith.constant 16 : index
    %c0_24 = arith.constant 0 : index
    %48 = vector.load %arg3[%c16_23, %c0_24] : memref<112x128xf32, #tpu.memory_space<vmem>>, vector<1x16xf32>
    %49 = vector.broadcast %48 : vector<1x16xf32> to vector<56x16xf32>
    %50 = arith.addf %47, %49 : vector<56x16xf32>
    %cst_25 = arith.constant 0.000000e+00 : f32
    %51 = vector.broadcast %cst_25 : f32 to vector<56x16xf32>
    %52 = arith.maximumf %50, %51 : vector<56x16xf32>
    %c48 = arith.constant 48 : index
    %c0_26 = arith.constant 0 : index
    %53 = vector.load %arg2[%c48, %c0_26] : memref<272x128xbf16, #tpu.memory_space<vmem>>, vector<16x16xbf16>
    %54 = arith.truncf %52 : vector<56x16xf32> to vector<56x16xbf16>
    %cst_27 = arith.constant dense<0.000000e+00> : vector<56x16xf32>
    %55 = tpu.matmul %54, %53, %cst_27 {dimension_numbers = #tpu.dot_dimension_numbers<[1], [0], [0], [1], [0, 0, 1, 1], [], []>} : vector<56x16xbf16>, vector<16x16xbf16>, vector<56x16xf32> -> vector<56x16xf32>
    %c24 = arith.constant 24 : index
    %c0_28 = arith.constant 0 : index
    %56 = vector.load %arg3[%c24, %c0_28] : memref<112x128xf32, #tpu.memory_space<vmem>>, vector<1x16xf32>
    %57 = vector.broadcast %56 : vector<1x16xf32> to vector<56x16xf32>
    %58 = arith.addf %55, %57 : vector<56x16xf32>
    %cst_29 = arith.constant 0.000000e+00 : f32
    %59 = vector.broadcast %cst_29 : f32 to vector<56x16xf32>
    %60 = arith.maximumf %58, %59 : vector<56x16xf32>
    %61 = arith.mulf %60, %60 : vector<56x16xf32>
    %62 = tpu.concatenate %60, %61 in 1 : vector<56x16xf32>, vector<56x16xf32> -> vector<56x32xf32>
    %cst_30 = arith.constant dense<0.000000e+00> : vector<32xf32>
    %63 = vector.multi_reduction <add>, %62, %cst_30 [0] : vector<56x32xf32> to vector<32xf32>
    %64 = vector.shape_cast %63 : vector<32xf32> to vector<1x32xf32>
    %cst_31 = arith.constant 5.600000e+01 : f32
    %65 = vector.broadcast %cst_31 : f32 to vector<1x32xf32>
    %66 = arith.divf %64, %65 : vector<1x32xf32>
    %67 = vector.extract_strided_slice %66 {offsets = [0, 0], sizes = [1, 16], strides = [1, 1]} : vector<1x32xf32> to vector<1x16xf32>
    %68 = vector.extract_strided_slice %66 {offsets = [0, 16], sizes = [1, 16], strides = [1, 1]} : vector<1x32xf32> to vector<1x16xf32>
    %69 = arith.mulf %67, %67 : vector<1x16xf32>
    %70 = arith.subf %68, %69 : vector<1x16xf32>
    %cst_32 = arith.constant 0.000000e+00 : f32
    %71 = vector.broadcast %cst_32 : f32 to vector<1x16xf32>
    %72 = arith.maximumf %70, %71 : vector<1x16xf32>
    %73 = vector.broadcast %67 : vector<1x16xf32> to vector<56x16xf32>
    %74 = arith.subf %60, %73 : vector<56x16xf32>
    %cst_33 = arith.constant 9.99999974E-6 : f32
    %75 = vector.broadcast %cst_33 : f32 to vector<1x16xf32>
    %76 = arith.addf %72, %75 : vector<1x16xf32>
    %77 = math.rsqrt %76 : vector<1x16xf32>
    %78 = vector.broadcast %77 : vector<1x16xf32> to vector<56x16xf32>
    %79 = arith.mulf %74, %78 : vector<56x16xf32>
    %80 = arith.truncf %79 : vector<56x16xf32> to vector<56x16xbf16>
    %cst_34 = arith.constant dense<0.000000e+00> : vector<8x16xf32>
    %81 = tpu.matmul %4, %80, %cst_34 {dimension_numbers = #tpu.dot_dimension_numbers<[1], [0], [0], [1], [0, 0, 1, 1], [], []>} : vector<8x56xbf16>, vector<56x16xbf16>, vector<8x16xf32> -> vector<8x16xf32>
    %c64_35 = arith.constant 64 : index
    %c0_36 = arith.constant 0 : index
    %82 = vector.load %arg2[%c64_35, %c0_36] : memref<272x128xbf16, #tpu.memory_space<vmem>>, vector<16x16xbf16>
    %83 = arith.truncf %81 : vector<8x16xf32> to vector<8x16xbf16>
    %cst_37 = arith.constant dense<0.000000e+00> : vector<8x16xf32>
    %84 = tpu.matmul %83, %82, %cst_37 {dimension_numbers = #tpu.dot_dimension_numbers<[1], [0], [0], [1], [0, 0, 1, 1], [], []>} : vector<8x16xbf16>, vector<16x16xbf16>, vector<8x16xf32> -> vector<8x16xf32>
    %c32_38 = arith.constant 32 : index
    %c0_39 = arith.constant 0 : index
    %85 = vector.load %arg3[%c32_38, %c0_39] : memref<112x128xf32, #tpu.memory_space<vmem>>, vector<1x16xf32>
    %86 = vector.broadcast %85 : vector<1x16xf32> to vector<8x16xf32>
    %87 = arith.addf %84, %86 : vector<8x16xf32>
    %cst_40 = arith.constant 0.000000e+00 : f32
    %88 = vector.broadcast %cst_40 : f32 to vector<8x16xf32>
    %89 = arith.maximumf %87, %88 : vector<8x16xf32>
    %c80 = arith.constant 80 : index
    %c0_41 = arith.constant 0 : index
    %90 = vector.load %arg2[%c80, %c0_41] : memref<272x128xbf16, #tpu.memory_space<vmem>>, vector<16x16xbf16>
    %91 = arith.truncf %89 : vector<8x16xf32> to vector<8x16xbf16>
    %cst_42 = arith.constant dense<0.000000e+00> : vector<8x16xf32>
    %92 = tpu.matmul %91, %90, %cst_42 {dimension_numbers = #tpu.dot_dimension_numbers<[1], [0], [0], [1], [0, 0, 1, 1], [], []>} : vector<8x16xbf16>, vector<16x16xbf16>, vector<8x16xf32> -> vector<8x16xf32>
    %c40 = arith.constant 40 : index
    %c0_43 = arith.constant 0 : index
    %93 = vector.load %arg3[%c40, %c0_43] : memref<112x128xf32, #tpu.memory_space<vmem>>, vector<1x16xf32>
    %94 = vector.broadcast %93 : vector<1x16xf32> to vector<8x16xf32>
    %95 = arith.addf %92, %94 : vector<8x16xf32>
    %cst_44 = arith.constant 0.000000e+00 : f32
    %96 = vector.broadcast %cst_44 : f32 to vector<8x16xf32>
    %97 = arith.maximumf %95, %96 : vector<8x16xf32>
    %98 = arith.mulf %97, %97 : vector<8x16xf32>
    %99 = tpu.concatenate %97, %98 in 1 : vector<8x16xf32>, vector<8x16xf32> -> vector<8x32xf32>
    %cst_45 = arith.constant dense<0.000000e+00> : vector<32xf32>
    %100 = vector.multi_reduction <add>, %99, %cst_45 [0] : vector<8x32xf32> to vector<32xf32>
    %101 = vector.shape_cast %100 : vector<32xf32> to vector<1x32xf32>
    %cst_46 = arith.constant 8.000000e+00 : f32
    %102 = vector.broadcast %cst_46 : f32 to vector<1x32xf32>
    %103 = arith.divf %101, %102 : vector<1x32xf32>
    %104 = vector.extract_strided_slice %103 {offsets = [0, 0], sizes = [1, 16], strides = [1, 1]} : vector<1x32xf32> to vector<1x16xf32>
    %105 = vector.extract_strided_slice %103 {offsets = [0, 16], sizes = [1, 16], strides = [1, 1]} : vector<1x32xf32> to vector<1x16xf32>
    %106 = arith.mulf %104, %104 : vector<1x16xf32>
    %107 = arith.subf %105, %106 : vector<1x16xf32>
    %cst_47 = arith.constant 0.000000e+00 : f32
    %108 = vector.broadcast %cst_47 : f32 to vector<1x16xf32>
    %109 = arith.maximumf %107, %108 : vector<1x16xf32>
    %110 = vector.broadcast %104 : vector<1x16xf32> to vector<8x16xf32>
    %111 = arith.subf %97, %110 : vector<8x16xf32>
    %cst_48 = arith.constant 9.99999974E-6 : f32
    %112 = vector.broadcast %cst_48 : f32 to vector<1x16xf32>
    %113 = arith.addf %109, %112 : vector<1x16xf32>
    %114 = math.rsqrt %113 : vector<1x16xf32>
    %115 = vector.broadcast %114 : vector<1x16xf32> to vector<8x16xf32>
    %116 = arith.mulf %111, %115 : vector<8x16xf32>
    %c96 = arith.constant 96 : index
    %c0_49 = arith.constant 0 : index
    %117 = vector.load %arg2[%c96, %c0_49] : memref<272x128xbf16, #tpu.memory_space<vmem>>, vector<16x32xbf16>
    %118 = arith.truncf %116 : vector<8x16xf32> to vector<8x16xbf16>
    %cst_50 = arith.constant dense<0.000000e+00> : vector<8x32xf32>
    %119 = tpu.matmul %118, %117, %cst_50 {dimension_numbers = #tpu.dot_dimension_numbers<[1], [0], [0], [1], [0, 0, 1, 1], [], []>} : vector<8x16xbf16>, vector<16x32xbf16>, vector<8x32xf32> -> vector<8x32xf32>
    %120 = vector.extract_strided_slice %119 {offsets = [0, 0], sizes = [8, 16], strides = [1, 1]} : vector<8x32xf32> to vector<8x16xf32>
    %121 = vector.extract_strided_slice %119 {offsets = [0, 16], sizes = [8, 16], strides = [1, 1]} : vector<8x32xf32> to vector<8x16xf32>
    %122 = tpu.concatenate %120, %121 in 0 : vector<8x16xf32>, vector<8x16xf32> -> vector<16x16xf32>
    %123 = arith.truncf %122 : vector<16x16xf32> to vector<16x16xbf16>
    %cst_51 = arith.constant dense<0.000000e+00> : vector<56x16xf32>
    %124 = tpu.matmul %2, %123, %cst_51 {dimension_numbers = #tpu.dot_dimension_numbers<[1], [0], [0], [1], [0, 0, 1, 1], [], []>} : vector<56x16xbf16>, vector<16x16xbf16>, vector<56x16xf32> -> vector<56x16xf32>
    %c112 = arith.constant 112 : index
    %c0_52 = arith.constant 0 : index
    %125 = vector.load %arg2[%c112, %c0_52] : memref<272x128xbf16, #tpu.memory_space<vmem>>, vector<16x16xbf16>
    %126 = arith.truncf %79 : vector<56x16xf32> to vector<56x16xbf16>
    %cst_53 = arith.constant dense<0.000000e+00> : vector<56x16xf32>
    %127 = tpu.matmul %126, %125, %cst_53 {dimension_numbers = #tpu.dot_dimension_numbers<[1], [0], [0], [1], [0, 0, 1, 1], [], []>} : vector<56x16xbf16>, vector<16x16xbf16>, vector<56x16xf32> -> vector<56x16xf32>
    %128 = arith.addf %124, %127 : vector<56x16xf32>
    %c48_54 = arith.constant 48 : index
    %c0_55 = arith.constant 0 : index
    %129 = vector.load %arg3[%c48_54, %c0_55] : memref<112x128xf32, #tpu.memory_space<vmem>>, vector<1x16xf32>
    %130 = vector.broadcast %129 : vector<1x16xf32> to vector<56x16xf32>
    %131 = arith.addf %128, %130 : vector<56x16xf32>
    %cst_56 = arith.constant 0.000000e+00 : f32
    %132 = vector.broadcast %cst_56 : f32 to vector<56x16xf32>
    %133 = arith.maximumf %131, %132 : vector<56x16xf32>
    %c128_57 = arith.constant 128 : index
    %c0_58 = arith.constant 0 : index
    %134 = vector.load %arg2[%c128_57, %c0_58] : memref<272x128xbf16, #tpu.memory_space<vmem>>, vector<16x16xbf16>
    %135 = arith.truncf %133 : vector<56x16xf32> to vector<56x16xbf16>
    %cst_59 = arith.constant dense<0.000000e+00> : vector<56x16xf32>
    %136 = tpu.matmul %135, %134, %cst_59 {dimension_numbers = #tpu.dot_dimension_numbers<[1], [0], [0], [1], [0, 0, 1, 1], [], []>} : vector<56x16xbf16>, vector<16x16xbf16>, vector<56x16xf32> -> vector<56x16xf32>
    %c56 = arith.constant 56 : index
    %c0_60 = arith.constant 0 : index
    %137 = vector.load %arg3[%c56, %c0_60] : memref<112x128xf32, #tpu.memory_space<vmem>>, vector<1x16xf32>
    %138 = vector.broadcast %137 : vector<1x16xf32> to vector<56x16xf32>
    %139 = arith.addf %136, %138 : vector<56x16xf32>
    %cst_61 = arith.constant 0.000000e+00 : f32
    %140 = vector.broadcast %cst_61 : f32 to vector<56x16xf32>
    %141 = arith.maximumf %139, %140 : vector<56x16xf32>
    %142 = arith.mulf %141, %141 : vector<56x16xf32>
    %143 = tpu.concatenate %141, %142 in 1 : vector<56x16xf32>, vector<56x16xf32> -> vector<56x32xf32>
    %cst_62 = arith.constant dense<0.000000e+00> : vector<32xf32>
    %144 = vector.multi_reduction <add>, %143, %cst_62 [0] : vector<56x32xf32> to vector<32xf32>
    %145 = vector.shape_cast %144 : vector<32xf32> to vector<1x32xf32>
    %cst_63 = arith.constant 5.600000e+01 : f32
    %146 = vector.broadcast %cst_63 : f32 to vector<1x32xf32>
    %147 = arith.divf %145, %146 : vector<1x32xf32>
    %148 = vector.extract_strided_slice %147 {offsets = [0, 0], sizes = [1, 16], strides = [1, 1]} : vector<1x32xf32> to vector<1x16xf32>
    %149 = vector.extract_strided_slice %147 {offsets = [0, 16], sizes = [1, 16], strides = [1, 1]} : vector<1x32xf32> to vector<1x16xf32>
    %150 = arith.mulf %148, %148 : vector<1x16xf32>
    %151 = arith.subf %149, %150 : vector<1x16xf32>
    %cst_64 = arith.constant 0.000000e+00 : f32
    %152 = vector.broadcast %cst_64 : f32 to vector<1x16xf32>
    %153 = arith.maximumf %151, %152 : vector<1x16xf32>
    %154 = vector.broadcast %148 : vector<1x16xf32> to vector<56x16xf32>
    %155 = arith.subf %141, %154 : vector<56x16xf32>
    %cst_65 = arith.constant 9.99999974E-6 : f32
    %156 = vector.broadcast %cst_65 : f32 to vector<1x16xf32>
    %157 = arith.addf %153, %156 : vector<1x16xf32>
    %158 = math.rsqrt %157 : vector<1x16xf32>
    %159 = vector.broadcast %158 : vector<1x16xf32> to vector<56x16xf32>
    %160 = arith.mulf %155, %159 : vector<56x16xf32>
    %c240 = arith.constant 240 : index
    %c0_66 = arith.constant 0 : index
    %161 = vector.load %arg2[%c240, %c0_66] : memref<272x128xbf16, #tpu.memory_space<vmem>>, vector<16x128xbf16>
    %162 = arith.truncf %160 : vector<56x16xf32> to vector<56x16xbf16>
    %cst_67 = arith.constant dense<0.000000e+00> : vector<56x128xf32>
    %163 = tpu.matmul %162, %161, %cst_67 {dimension_numbers = #tpu.dot_dimension_numbers<[1], [0], [0], [1], [0, 0, 1, 1], [], []>} : vector<56x16xbf16>, vector<16x128xbf16>, vector<56x128xf32> -> vector<56x128xf32>
    %c96_68 = arith.constant 96 : index
    %c0_69 = arith.constant 0 : index
    %164 = vector.load %arg3[%c96_68, %c0_69] : memref<112x128xf32, #tpu.memory_space<vmem>>, vector<1x128xf32>
    %165 = vector.broadcast %164 : vector<1x128xf32> to vector<56x128xf32>
    %166 = arith.addf %163, %165 : vector<56x128xf32>
    %167 = arith.addf %166, %1 : vector<56x128xf32>
    %cst_70 = arith.constant 1.000000e+01 : f32
    %168 = vector.broadcast %cst_70 : f32 to vector<56x128xf32>
    %169 = arith.mulf %167, %168 : vector<56x128xf32>
    %cst_71 = arith.constant dense<0xFF800000> : vector<56xf32>
    %170 = vector.multi_reduction <maximumf>, %169, %cst_71 [1] : vector<56x128xf32> to vector<56xf32>
    %171 = vector.shape_cast %170 : vector<56xf32> to vector<56x1xf32>
    %172 = vector.broadcast %171 : vector<56x1xf32> to vector<56x128xf32>
    %173 = arith.subf %169, %172 : vector<56x128xf32>
    %174 = math.exp %173 : vector<56x128xf32>
    %cst_72 = arith.constant dense<0.000000e+00> : vector<56xf32>
    %175 = vector.multi_reduction <add>, %174, %cst_72 [1] : vector<56x128xf32> to vector<56xf32>
    %176 = vector.shape_cast %175 : vector<56xf32> to vector<56x1xf32>
    %177 = tpu.reciprocal %176 {approx = true} : vector<56x1xf32> -> vector<56x1xf32>
    %178 = vector.broadcast %177 : vector<56x1xf32> to vector<56x128xf32>
    %179 = arith.mulf %174, %178 : vector<56x128xf32>
    %cst_73 = arith.constant dense<0xFF800000> : vector<56xf32>
    %180 = vector.multi_reduction <maximumf>, %166, %cst_73 [1] : vector<56x128xf32> to vector<56xf32>
    %181 = vector.shape_cast %180 : vector<56xf32> to vector<56x1xf32>
    %182 = vector.broadcast %181 : vector<56x1xf32> to vector<56x128xf32>
    %183 = arith.subf %166, %182 : vector<56x128xf32>
    %184 = math.exp %183 : vector<56x128xf32>
    %cst_74 = arith.constant dense<0.000000e+00> : vector<56xf32>
    %185 = vector.multi_reduction <add>, %184, %cst_74 [1] : vector<56x128xf32> to vector<56xf32>
    %186 = vector.shape_cast %185 : vector<56xf32> to vector<56x1xf32>
    %187 = tpu.reciprocal %186 {approx = true} : vector<56x1xf32> -> vector<56x1xf32>
    %188 = vector.broadcast %187 : vector<56x1xf32> to vector<56x128xf32>
    %189 = arith.mulf %184, %188 : vector<56x128xf32>
    %c144 = arith.constant 144 : index
    %c0_75 = arith.constant 0 : index
    %190 = vector.load %arg2[%c144, %c0_75] : memref<272x128xbf16, #tpu.memory_space<vmem>>, vector<32x32xbf16>
    %cst_76 = arith.constant dense<0.000000e+00> : vector<56x32xf32>
    %191 = tpu.matmul %3, %190, %cst_76 {dimension_numbers = #tpu.dot_dimension_numbers<[1], [0], [0], [1], [0, 0, 1, 1], [], []>} : vector<56x32xbf16>, vector<32x32xbf16>, vector<56x32xf32> -> vector<56x32xf32>
    %c64_77 = arith.constant 64 : index
    %c0_78 = arith.constant 0 : index
    %192 = vector.load %arg3[%c64_77, %c0_78] : memref<112x128xf32, #tpu.memory_space<vmem>>, vector<1x32xf32>
    %193 = vector.broadcast %192 : vector<1x32xf32> to vector<56x32xf32>
    %194 = arith.addf %191, %193 : vector<56x32xf32>
    %195 = math.tanh %194 : vector<56x32xf32>
    %c176 = arith.constant 176 : index
    %c0_79 = arith.constant 0 : index
    %196 = vector.load %arg2[%c176, %c0_79] : memref<272x128xbf16, #tpu.memory_space<vmem>>, vector<32x32xbf16>
    %197 = arith.truncf %195 : vector<56x32xf32> to vector<56x32xbf16>
    %cst_80 = arith.constant dense<0.000000e+00> : vector<56x32xf32>
    %198 = tpu.matmul %197, %196, %cst_80 {dimension_numbers = #tpu.dot_dimension_numbers<[1], [0], [0], [1], [0, 0, 1, 1], [], []>} : vector<56x32xbf16>, vector<32x32xbf16>, vector<56x32xf32> -> vector<56x32xf32>
    %c72 = arith.constant 72 : index
    %c0_81 = arith.constant 0 : index
    %199 = vector.load %arg3[%c72, %c0_81] : memref<112x128xf32, #tpu.memory_space<vmem>>, vector<1x32xf32>
    %200 = vector.broadcast %199 : vector<1x32xf32> to vector<56x32xf32>
    %201 = arith.addf %198, %200 : vector<56x32xf32>
    %202 = math.tanh %201 : vector<56x32xf32>
    %cst_82 = arith.constant 5.000000e-01 : f32
    %203 = vector.broadcast %cst_82 : f32 to vector<56x128xf32>
    %204 = arith.mulf %179, %203 : vector<56x128xf32>
    %205 = vector.extract_strided_slice %202 {offsets = [0, 0], sizes = [56, 16], strides = [1, 1]} : vector<56x32xf32> to vector<56x16xf32>
    %206 = vector.extract_strided_slice %204 {offsets = [0, 0], sizes = [56, 1], strides = [1, 1]} : vector<56x128xf32> to vector<56x1xf32>
    %207 = vector.broadcast %206 : vector<56x1xf32> to vector<56x16xf32>
    %208 = arith.mulf %205, %207 : vector<56x16xf32>
    %209 = vector.extract_strided_slice %202 {offsets = [0, 16], sizes = [56, 16], strides = [1, 1]} : vector<56x32xf32> to vector<56x16xf32>
    %210 = vector.extract_strided_slice %204 {offsets = [0, 1], sizes = [56, 1], strides = [1, 1]} : vector<56x128xf32> to vector<56x1xf32>
    %211 = vector.broadcast %210 : vector<56x1xf32> to vector<56x16xf32>
    %212 = arith.mulf %209, %211 : vector<56x16xf32>
    %213 = arith.addf %208, %212 : vector<56x16xf32>
    %214 = arith.truncf %213 : vector<56x16xf32> to vector<56x16xbf16>
    %cst_83 = arith.constant dense<0.000000e+00> : vector<8x16xf32>
    %215 = tpu.matmul %4, %214, %cst_83 {dimension_numbers = #tpu.dot_dimension_numbers<[1], [0], [0], [1], [0, 0, 1, 1], [], []>} : vector<8x56xbf16>, vector<56x16xbf16>, vector<8x16xf32> -> vector<8x16xf32>
    %c208 = arith.constant 208 : index
    %c0_84 = arith.constant 0 : index
    %216 = vector.load %arg2[%c208, %c0_84] : memref<272x128xbf16, #tpu.memory_space<vmem>>, vector<16x16xbf16>
    %217 = arith.truncf %215 : vector<8x16xf32> to vector<8x16xbf16>
    %cst_85 = arith.constant dense<0.000000e+00> : vector<8x16xf32>
    %218 = tpu.matmul %217, %216, %cst_85 {dimension_numbers = #tpu.dot_dimension_numbers<[1], [0], [0], [1], [0, 0, 1, 1], [], []>} : vector<8x16xbf16>, vector<16x16xbf16>, vector<8x16xf32> -> vector<8x16xf32>
    %c80_86 = arith.constant 80 : index
    %c0_87 = arith.constant 0 : index
    %219 = vector.load %arg3[%c80_86, %c0_87] : memref<112x128xf32, #tpu.memory_space<vmem>>, vector<1x16xf32>
    %220 = vector.broadcast %219 : vector<1x16xf32> to vector<8x16xf32>
    %221 = arith.addf %218, %220 : vector<8x16xf32>
    %cst_88 = arith.constant 0.000000e+00 : f32
    %222 = vector.broadcast %cst_88 : f32 to vector<8x16xf32>
    %223 = arith.maximumf %221, %222 : vector<8x16xf32>
    %c224 = arith.constant 224 : index
    %c0_89 = arith.constant 0 : index
    %224 = vector.load %arg2[%c224, %c0_89] : memref<272x128xbf16, #tpu.memory_space<vmem>>, vector<16x16xbf16>
    %225 = arith.truncf %223 : vector<8x16xf32> to vector<8x16xbf16>
    %cst_90 = arith.constant dense<0.000000e+00> : vector<8x16xf32>
    %226 = tpu.matmul %225, %224, %cst_90 {dimension_numbers = #tpu.dot_dimension_numbers<[1], [0], [0], [1], [0, 0, 1, 1], [], []>} : vector<8x16xbf16>, vector<16x16xbf16>, vector<8x16xf32> -> vector<8x16xf32>
    %c88 = arith.constant 88 : index
    %c0_91 = arith.constant 0 : index
    %227 = vector.load %arg3[%c88, %c0_91] : memref<112x128xf32, #tpu.memory_space<vmem>>, vector<1x16xf32>
    %228 = vector.broadcast %227 : vector<1x16xf32> to vector<8x16xf32>
    %229 = arith.addf %226, %228 : vector<8x16xf32>
    %cst_92 = arith.constant 0.000000e+00 : f32
    %230 = vector.broadcast %cst_92 : f32 to vector<8x16xf32>
    %231 = arith.maximumf %229, %230 : vector<8x16xf32>
    %c256 = arith.constant 256 : index
    %c0_93 = arith.constant 0 : index
    %232 = vector.load %arg2[%c256, %c0_93] : memref<272x128xbf16, #tpu.memory_space<vmem>>, vector<16x128xbf16>
    %233 = arith.truncf %231 : vector<8x16xf32> to vector<8x16xbf16>
    %cst_94 = arith.constant dense<0.000000e+00> : vector<8x128xf32>
    %234 = tpu.matmul %233, %232, %cst_94 {dimension_numbers = #tpu.dot_dimension_numbers<[1], [0], [0], [1], [0, 0, 1, 1], [], []>} : vector<8x16xbf16>, vector<16x128xbf16>, vector<8x128xf32> -> vector<8x128xf32>
    %c104 = arith.constant 104 : index
    %c0_95 = arith.constant 0 : index
    %235 = vector.load %arg3[%c104, %c0_95] : memref<112x128xf32, #tpu.memory_space<vmem>>, vector<1x128xf32>
    %236 = vector.broadcast %235 : vector<1x128xf32> to vector<8x128xf32>
    %237 = arith.addf %234, %236 : vector<8x128xf32>
    %c0_96 = arith.constant 0 : index
    %c0_97 = arith.constant 0 : index
    %238 = vector.load %arg4[%c0_96, %c0_97] : memref<120x128xf32, #tpu.memory_space<vmem>>, vector<56x128xf32>
    tpu.vector_store %arg4[%c0_96, %c0_97], %179 {strides = array<i32>} : memref<120x128xf32, #tpu.memory_space<vmem>>, vector<56x128xf32>,
    %c56_98 = arith.constant 56 : index
    %c0_99 = arith.constant 0 : index
    %239 = vector.load %arg4[%c56_98, %c0_99] : memref<120x128xf32, #tpu.memory_space<vmem>>, vector<56x128xf32>
    tpu.vector_store %arg4[%c56_98, %c0_99], %189 {strides = array<i32>} : memref<120x128xf32, #tpu.memory_space<vmem>>, vector<56x128xf32>,
    %c112_100 = arith.constant 112 : index
    %c0_101 = arith.constant 0 : index
    %240 = vector.load %arg4[%c112_100, %c0_101] : memref<120x128xf32, #tpu.memory_space<vmem>>, vector<8x128xf32>
    tpu.vector_store %arg4[%c112_100, %c0_101], %237 {strides = array<i32>} : memref<120x128xf32, #tpu.memory_space<vmem>>, vector<8x128xf32>,
    return
  }
}

</mosaic_0001>

<bundles_post_ra>
// kernel: tpu_custom_call.1
= control target key start
LH: loop header
LB: loop body
LE: loop exit
PB: predicated region body
PF: predicated region fallthrough
CT: control target
= control target key end

     0   :  { %9 = vsyncpa [#allocation3], 0  ;;  %s3088_s0 = inlined_call_operand.hbm [shape: bf16[144,128], index: 0, kind: input, shape index: {}]   ;;  %s3089_s1 = inlined_call_operand.hbm [shape: f32[64,128], index: 1, kind: input, shape index: {}]   ;;  %s3090_s2 = inlined_call_operand.hbm [shape: bf16[272,128], index: 2, kind: input, shape index: {}]   ;;  %s3091_s3 = inlined_call_operand.hbm [shape: f32[112,128], index: 3, kind: input, shape index: {}]   ;;  %s3092_s4 = inlined_call_operand.hbm [shape: f32[120,128], index: 4, kind: output, shape index: {}]  }
   0x1   :  { %10 = vsyncpa [#allocation6], 0 }
   0x2   :  { %11 = vsyncpa [#allocation9], 0 }
   0x3   :  { %12 = vsyncpa [#allocation4], 0  ;;  %s2633_s15 = smov [#allocation5]   ;;  %s2515_s19 = scalar_lea.hbm %s3089_s1, 1024 }
   0x4   :  { %s30_s16 = sshll.u32 %s2633_s15, 4  ;;  %p2516_p0 = scmp.ne.s32.totalorder %s3089_s1, %s2515_s19  ;;  %s31_s16 = int_to_ptr.vmem [resolvable:$true] %s30_s16 }
   0x5   :  { %p2519_p1 = scmp.lt.u32.totalorder %s2515_s19, %s3089_s1 }
   0x7   :  { %p2521_p2 = pnand %p2519_p1, %p2516_p0 }
   0x9   :  { %2524 = shalt.err (!%p2521_p2)
}
   0xa   :  { %s2525_s24 = scalar_lea.vmem %s31_s16, 1024  ;;  %p2530_p4 = scmp.lt.s32.totalorder %s31_s16, %s31_s16 }
   0xb   :  { %p2526_p3 = scmp.ne.s32.totalorder %s31_s16, %s2525_s24  ;;  %p2531_p5 = scmp.lt.s32.totalorder %s2525_s24, %s2525_s24 }
   0xd   :  { %p2532_p6 = por %p2531_p5, %p2530_p4 }
   0xf   :  { %p2533_p7 = pnand %p2532_p6, %p2526_p3 }
  0x11   :  { %2536 = shalt.err (!%p2533_p7)
}
  0x12   :  { %s2634_s25 = smov 128   ;;  %s2635_s26 = smov 8  }
  0x13   :  { %36 = dma.hbm_to_vmem [thread:$0]  %s3089_s1, 1024, %s31_s16, [#allocation6], %s2634_s25, %s2634_s25, %s2635_s26  }
  0x14   :  { %s2636_s29 = smov [#allocation2]   ;;  %s2537_s7 = scalar_lea.hbm %s3088_s0, 1152 }
  0x15   :  { %s18_s30 = sshll.u32 %s2636_s29, 4  ;;  %p2538_p8 = scmp.ne.s32.totalorder %s3088_s0, %s2537_s7  ;;  %s19_s30 = int_to_ptr.vmem [resolvable:$true] %s18_s30 }
  0x16   :  { %p2541_p9 = scmp.lt.u32.totalorder %s2537_s7, %s3088_s0 }
  0x18   :  { %p2543_p10 = pnand %p2541_p9, %p2538_p8 }
  0x1a   :  { %2546 = shalt.err (!%p2543_p10)
}
  0x1b   :  { %s2547_s12 = scalar_lea.vmem %s19_s30, 1152  ;;  %p2552_p12 = scmp.lt.s32.totalorder %s19_s30, %s19_s30 }
  0x1c   :  { %p2548_p11 = scmp.ne.s32.totalorder %s19_s30, %s2547_s12  ;;  %p2553_p13 = scmp.lt.s32.totalorder %s2547_s12, %s2547_s12 }
  0x1e   :  { %p2554_p0 = por %p2553_p13, %p2552_p12 }
  0x20   :  { %p2555_p1 = pnand %p2554_p0, %p2548_p11 }
  0x22   :  { %2558 = shalt.err (!%p2555_p1)
}
  0x23   :  { %s2637_s1 = smov 64   ;;  %s2638_s13 = smov 4  }
  0x24   :  { %24 = dma.hbm_to_vmem [thread:$0]  %s3088_s0, 1152, %s19_s30, [#allocation3], %s2637_s1, %s2637_s1, %s2638_s13  }
  0x25   :  { %s2639_s16 = smov [#allocation7]   ;;  %s2640_s18 = smov [#allocation8]  }
  0x26   :  { %s42_s17 = sshll.u32 %s2639_s16, 4  ;;  %s54_s19 = sshll.u32 %s2640_s18, 4  ;;  %s43_s17 = int_to_ptr.vmem [resolvable:$true] %s42_s17  ;;  %s2700_s19 = int_to_ptr.vmem [resolvable:$true] %s54_s19 }
  0x27   :  { %s2559_s22 = scalar_lea.hbm %s3090_s2, 2176 }
  0x28   :  { %p2560_p2 = scmp.ne.s32.totalorder %s3090_s2, %s2559_s22  ;;  %p2563_p3 = scmp.lt.u32.totalorder %s2559_s22, %s3090_s2 }
  0x2a   :  { %p2565_p4 = pnand %p2563_p3, %p2560_p2 }
  0x2c   :  { %2568 = shalt.err (!%p2565_p4)
}
  0x2d   :  { %s2569_s0 = scalar_lea.vmem %s43_s17, 2176  ;;  %p2574_p6 = scmp.lt.s32.totalorder %s43_s17, %s43_s17 }
  0x2e   :  { %p2570_p5 = scmp.ne.s32.totalorder %s43_s17, %s2569_s0  ;;  %p2575_p7 = scmp.lt.s32.totalorder %s2569_s0, %s2569_s0 }
  0x30   :  { %p2576_p8 = por %p2575_p7, %p2574_p6 }
  0x32   :  { %p2577_p9 = pnand %p2576_p8, %p2570_p5 }
  0x34   :  { %2580 = shalt.err (!%p2577_p9)
}
  0x35   :  { %48 = dma.hbm_to_vmem [thread:$0]  %s3090_s2, 2176, %s43_s17, [#allocation6], %s2637_s1, %s2637_s1, %s2638_s13  }
  0x36   :  { %s2581_s7 = scalar_lea.hbm %s3091_s3, 1792 }
  0x37   :  { %p2582_p10 = scmp.ne.s32.totalorder %s3091_s3, %s2581_s7  ;;  %p2585_p11 = scmp.lt.u32.totalorder %s2581_s7, %s3091_s3 }
  0x39   :  { %p2587_p12 = pnand %p2585_p11, %p2582_p10 }
  0x3b   :  { %2590 = shalt.err (!%p2587_p12)
}
  0x3c   :  { %s2591_s12 = scalar_lea.vmem %s2700_s19, 1792  ;;  %p2596_p0 = scmp.lt.s32.totalorder %s2700_s19, %s2700_s19 }
  0x3d   :  { %p2592_p13 = scmp.ne.s32.totalorder %s2700_s19, %s2591_s12  ;;  %p2597_p1 = scmp.lt.s32.totalorder %s2591_s12, %s2591_s12 }
  0x3f   :  { %p2598_p2 = por %p2597_p1, %p2596_p0 }
  0x41   :  { %p2599_p3 = pnand %p2598_p2, %p2592_p13 }
  0x43   :  { %2602 = shalt.err (!%p2599_p3)
}
  0x44   :  { %60 = dma.hbm_to_vmem [thread:$0]  %s3091_s3, 1792, %s2700_s19, [#allocation9], %s2634_s25, %s2634_s25, %s2635_s26  }
  0x45   :  { %2625 = dma.done.wait [#allocation3], 1152  }
  0x46   :  { %2626 = vsyncadd [#allocation3], 4294966144 }
  0x47   :  { %2627 = dma.done.wait [#allocation6], 3200  }
  0x48   :  { %2628 = vsyncadd [#allocation6], 4294964096 }
  0x49   :  { %2629 = dma.done.wait [#allocation9], 1792  }
  0x4a   :  { %2630 = vsyncadd [#allocation9], 4294965504  ;;  %v2641_v0 = vmov 0.0   ;;  %vm2642_vm0 = vmmov 0   ;;  %v2397_v1 = vld [vmem:[#allocation7] sm:$0xff]   ;;  %vm111_vm1 = vcmask 130048   ;;  %v240_v36 = vlaneseq }
  0x4b   :  { %2211 = vmatprep.subr.bf16.mxu0 %v2641_v0  ;;  %2213 = vmatprep.mubr.msk.bf16.mxu0 %vm2642_vm0, %v2641_v0  ;;  %v74_v2 = vld [vmem:[#allocation5] sm:$0xff]  ;;  %v2398_v4 = vld [vmem:[#allocation7 + $0x8] sm:$0xff]   ;;  %v2062_v13 = vld [vmem:[#allocation8 + $0x8] ss:$0 sm:$0xff]  ;;  %s2643_s3 = smov 16   ;;  %vm220_vm2 = vcmask 261120  }
  0x4c   :  { %2217 = vmatprep.subr.bf16.mxu1 %v2641_v0  ;;  %2219 = vmatprep.mubr.msk.bf16.mxu1 %vm2642_vm0, %v2641_v0  ;;  %v99_v3 = vpack.c.bf16 %v74_v2, %v74_v2  ;;  %v2059_v5 = vld [vmem:[#allocation8] ss:$0 sm:$0xff]  ;;  %v2399_v37 = vld [vmem:[#allocation7 + $0x10] sm:$0xff]   ;;  %v241_v38 = vshrl.u32 %v240_v36, 7  ;;  %s2644_s13 = smov 112   ;;  %v2754_v46 = vld [vmem:[#allocation2] sm:$0xff]  }
  0x4d   :  { %2212 = vmatpush3.bf16.msra.mxu0 %v2397_v1  ;;  %2218 = vmatpush3.bf16.msra.mxu1 %v2398_v4  ;;  %v2759_v53 = vld [vmem:[#allocation2 + $0x8] sm:$0xff]   ;;  %v2761_v54 = vld [vmem:[#allocation2 + $0x10] sm:$0xff]   ;;  %v2768_v55 = vld [vmem:[#allocation2 + $0x18] ss:$0 sps:$4 sm:$0xff]   ;;  %vm614_vm3 = vcmask 1043456   ;;  %vm610_vm4 = vcmask 457728  }
  0x4e   :  { %2223 = vmatprep.subr.bf16.mxu0 %v2641_v0  ;;  %v2749_v39 = vsub.s32 0, %v241_v38  ;;  %v2404_v56 = vld [vmem:[#allocation7 + $0x18] sm:$0xff]   ;;  %s2647_s14 = smov [#allocation10]  }
  0x4f   :  { %v2067_v57 = vld [vmem:[#allocation8 + $0x10] ss:$0 sm:$0xff]  ;;  %s2045_s15 = sshll.u32 %s2647_s14, 4  ;;  %s2046_s15 = int_to_ptr.vmem [resolvable:$true] %s2045_s15 }
  0x50   :  { %2214 = vmatmul.mubr.msk.bf16.vlgmr.msra.gmra.mrb[0].mxu0 %vm111_vm1, %v99_v3  ;;  %s2603_s16 = scalar_lea.vmem %s2046_s15, 1920  ;;  %p2608_p5 = scmp.lt.s32.totalorder %s2046_s15, %s2046_s15 }
  0x51   :  { %2225 = vmatprep.mubr.msk.bf16.mxu0 %vm2642_vm0, %v2641_v0  ;;  %2224 = vmatpush3.bf16.msra.mxu0 %v2399_v37  ;;  %p2604_p4 = scmp.ne.s32.totalorder %s2046_s15, %s2603_s16  ;;  %p2609_p6 = scmp.lt.s32.totalorder %s2603_s16, %s2603_s16 }
  0x52   :  { %2239 = vmatprep.subr.bf16.mxu0 %v2404_v56 }
  0x53   :  { %p2610_p7 = por %p2609_p6, %p2608_p5 }
  0x55   :  { %p2611_p8 = pnand %p2610_p7, %p2604_p4 }
 0x123   :  { %v149_v6 = vpop.f32.mrb[0].mxu0 }
 0x124   :  { %v150_v7 = vadd.f32 %v2059_v5, %v149_v6  ;;  %v2215_v8 = vpop.f32.mrb[1].mxu0 }
 0x125   :  { %v152_v9 = vpop.f32.mrb[2].mxu0 }
 0x126   :  { %v155_v10 = vmax.f32 %v150_v7, 0.0  ;;  %v2216_v11 = vpop.f32.mrb[3].mxu0 }
 0x128   :  { %v158_v12 = vpack.c.bf16 %v155_v10, %v155_v10 }
 0x12a   :  { %2220 = vmatmul.mubr.msk.bf16.vlgmr.msra.gmra.mrb[0].mxu1 %vm111_vm1, %v158_v12 }
 0x12b   :  { %2231 = vmatprep.mubr.msk.bf16.mxu1 %vm111_vm1, %v2754_v46 }
 0x1fd   :  { %v207_v14 = vpop.f32.mrb[0].mxu1 }
 0x1fe   :  { %v208_v15 = vadd.f32 %v2062_v13, %v207_v14  ;;  %v2221_v16 = vpop.f32.mrb[1].mxu1 }
 0x1ff   :  { %v210_v17 = vpop.f32.mrb[2].mxu1 }
 0x200   :  { %v213_v18 = vmax.f32 %v208_v15, 0.0  ;;  %v2222_v19 = vpop.f32.mrb[3].mxu1 }
 0x202   :  { %v214_v20 = vmul.f32 %v213_v18, %v213_v18 }
 0x204   :  { %216 = vrot.lane.b32.xlu0 %v214_v20, %s2643_s3 }
 0x276   :  { %v217_v21 = vpop.permute.xlu0 %216 }
 0x277   :  { %v219_v22 = vsel %vm111_vm1, %v213_v18, %v217_v21  ;;  %v2076_v21 = vld [vmem:[#allocation8 + $0x18] ss:$0 sm:$0xff] }
 0x278   :  { %v221_v23 = vsel %vm220_vm2, %v219_v22, 0.0 }
 0x279   :  { %v222_v24 = vrot.slane %v221_v23, 4 }
 0x27b   :  { %v223_v25 = vadd.f32 %v222_v24, %v221_v23 }
 0x27d   :  { %v224_v26 = vrot.slane %v223_v25, 2 }
 0x27f   :  { %v225_v27 = vadd.f32 %v224_v26, %v223_v25 }
 0x281   :  { %v226_v28 = vrot.slane %v225_v27, 1 }
 0x283   :  { %v227_v29 = vadd.f32 %v226_v28, %v225_v27 }
 0x285   :  { %v229_v30 = vmul.f32 0.125, %v227_v29 }
 0x287   :  { %v230_v31 = vmul.f32 %v229_v30, %v229_v30  ;;  %v237_v42 = vsub.f32 %v213_v18, %v229_v30 }
 0x289   :  { %232 = vrot.lane.b32.xlu0 %v230_v31, %s2643_s3 }
 0x2fb   :  { %v233_v32 = vpop.permute.xlu0 %232 }
 0x2fc   :  { %v235_v33 = vsub.f32 %v229_v30, %v233_v32 }
 0x2fe   :  { %v236_v34 = vmax.f32 %v235_v33, 0.0 }
 0x300   :  { %v238_v35 = vadd.f32 1e-05, %v236_v34 }
 0x302   :  { %2422 = vrsqrt.f32 %v238_v35 }
 0x30c   :  { %v2423_v40 = vpop.eup %2422 }
 0x30d   :  { %v243_v41 = vrot.slane %v2423_v40, %v2749_v39 }
 0x30f   :  { %245 = vrot.lane.b32.xlu1 %v243_v41, %s2644_s13 }
 0x381   :  { %v246_v43 = vpop.permute.xlu1 %245 }
 0x382   :  { %v248_v44 = vmul.f32 %v246_v43, %v237_v42 }
 0x384   :  { %v251_v45 = vpack.c.bf16 %v248_v44, %v248_v44 }
 0x386   :  { %2226 = vmatmul.mubr.msk.bf16.vlgmr.msra.gmra.mrb[4].mxu0 %vm111_vm1, %v251_v45 }
 0x387   :  { %2240 = vmatpush3.bf16.msra.mxu0 %v2404_v56 }
 0x388   :  { %2261 = vmatprep.subr.bf16.mxu0 %v2641_v0 }
 0x459   :  { %v295_v47 = vpop.f32.mrb[4].mxu0 }
 0x45a   :  { %302 = vrot.lane.b32.xlu1 %v295_v47, %s2644_s13  ;;  %v2227_v48 = vpop.f32.mrb[5].mxu0 }
 0x45b   :  { %v298_v49 = vpop.f32.mrb[6].mxu0 }
 0x45c   :  { %v2228_v50 = vpop.f32.mrb[7].mxu0 }
 0x4cc   :  { %v303_v51 = vpop.permute.xlu1 %302 }
 0x4cd   :  { %v305_v52 = vpack.c.bf16 %v303_v51, %v295_v47 }
 0x4cf   :  { %2229 = vmatprep.subr.bf16.mxu1 %v305_v52 }
 0x4d0   :  { %2230 = vmatpush3.bf16.msra.mxu1 %v305_v52 }
 0x4d1   :  { %2249 = vmatprep.subr.bf16.mxu1 %v2641_v0 }
 0x4d3   :  { %2232 = vmatmul.mubr.msk.bf16.vlgmr.msra.gmra.mrb[4].mxu1 %vm111_vm1, %v2759_v53 }
 0x4d4   :  { %2235 = vmatprep.mubr.msk.bf16.mxu1 %vm111_vm1, %v2761_v54 }
 0x4db   :  { %2236 = vmatmul.mubr.msk.bf16.gmra.mrb[8].mxu1 %vm111_vm1, %v2768_v55 }
 0x4dc   :  { %2257 = vmatprep.mubr.msk.bf16.mxu1 %vm2642_vm0, %v2641_v0 }
 0x5a6   :  { %v2233_v58 = vpop.f32.mrb[4].mxu1 }
 0x5a7   :  { %v384_v59 = vadd.f32 %v2233_v58, %v2067_v57  ;;  %v375_v60 = vpop.f32.mrb[5].mxu1 }
 0x5a8   :  { %v376_v61 = vadd.f32 %v2067_v57, %v375_v60  ;;  %v2234_v62 = vpop.f32.mrb[6].mxu1 }
 0x5a9   :  { %v387_v63 = vadd.f32 %v2234_v62, %v2067_v57  ;;  %v378_v1 = vpop.f32.mrb[7].mxu1  ;;  %v407_v3 = vmax.f32 %v384_v59, 0.0 }
 0x5aa   :  { %v379_v2 = vadd.f32 %v2067_v57, %v378_v1  ;;  %v405_v5 = vmax.f32 %v376_v61, 0.0 }
 0x5ab   :  { %v408_v4 = vmax.f32 %v387_v63, 0.0 }
 0x5ac   :  { %v406_v6 = vmax.f32 %v379_v2, 0.0 }
 0x5ad   :  { %v415_v7 = vpack.c.bf16 %v408_v4, %v407_v3 }
 0x5ae   :  { %v414_v8 = vpack.c.bf16 %v406_v6, %v405_v5  ;;  %v2237_v9 = vpop.f32.mrb[8].mxu1 }
 0x5af   :  { %v400_v10 = vadd.f32 %v2237_v9, %v2067_v57  ;;  %v391_v11 = vpop.f32.mrb[9].mxu1 }
 0x5b0   :  { %v392_v12 = vadd.f32 %v2067_v57, %v391_v11  ;;  %v2238_v13 = vpop.f32.mrb[10].mxu1  ;;  %2241 = vmatprep.mubr.msk.bf16.mxu0 %vm111_vm1, %v414_v8 }
 0x5b1   :  { %v394_v14 = vpop.f32.mrb[11].mxu1  ;;  %2242 = vmatmul.mubr.msk.bf16.vlgmr.msra.gmra.mrb[8].mxu0 %vm111_vm1, %v415_v7  ;;  %v411_v16 = vmax.f32 %v400_v10, 0.0 }
 0x5b2   :  { %v395_v15 = vadd.f32 %v2067_v57, %v394_v14  ;;  %v409_v17 = vmax.f32 %v392_v12, 0.0 }
 0x5b3   :  { %v417_v20 = vpack.c.bf16 %v411_v16, %v411_v16 }
 0x5b4   :  { %v410_v18 = vmax.f32 %v395_v15, 0.0 }
 0x5b6   :  { %v416_v19 = vpack.c.bf16 %v410_v18, %v409_v17 }
 0x5b8   :  { %2245 = vmatprep.mubr.msk.bf16.mxu0 %vm111_vm1, %v416_v19 }
 0x5b9   :  { %2246 = vmatmul.mubr.msk.bf16.gmra.mrb[12].mxu0 %vm111_vm1, %v417_v20 }
 0x5ba   :  { %2263 = vmatprep.mubr.msk.bf16.mxu0 %vm2642_vm0, %v2641_v0 }
 0x684   :  { %v2243_v22 = vpop.f32.mrb[8].mxu0 }
 0x685   :  { %v475_v23 = vpop.f32.mrb[9].mxu0  ;;  %v484_v24 = vadd.f32 %v2243_v22, %v2076_v21 }
 0x686   :  { %v476_v25 = vadd.f32 %v2076_v21, %v475_v23  ;;  %v2244_v26 = vpop.f32.mrb[10].mxu0 }
 0x687   :  { %v478_v27 = vpop.f32.mrb[11].mxu0  ;;  %v487_v29 = vadd.f32 %v2244_v26, %v2076_v21  ;;  %v2783_v31 = vmax.f32 %v484_v24, 0.0 }
 0x688   :  { %v2781_v28 = vmax.f32 %v476_v25, 0.0  ;;  %v479_v30 = vadd.f32 %v2076_v21, %v478_v27 }
 0x689   :  { %v2789_v34 = vmax.f32 %v487_v29, 0.0  ;;  %v514_v42 = vmul.f32 %v2783_v31, %v2783_v31 }
 0x68a   :  { %v2785_v32 = vmax.f32 %v479_v30, 0.0  ;;  %v512_v33 = vmul.f32 %v2781_v28, %v2781_v28 }
 0x68b   :  { %v515_v47 = vmul.f32 %v2789_v34, %v2789_v34 }
 0x68c   :  { %v2247_v35 = vpop.f32.mrb[12].mxu0  ;;  %526 = vrot.lane.b32.xlu0 %v512_v33, %s2643_s3  ;;  %v513_v36 = vmul.f32 %v2785_v32, %v2785_v32 }
 0x68d   :  { %v491_v37 = vpop.f32.mrb[13].mxu0  ;;  %v500_v38 = vadd.f32 %v2247_v35, %v2076_v21 }
 0x68e   :  { %v492_v40 = vadd.f32 %v2076_v21, %v491_v37  ;;  %v2248_v41 = vpop.f32.mrb[14].mxu0  ;;  %528 = vrot.lane.b32.xlu1 %v513_v36, %s2643_s3 }
 0x68f   :  { %v494_v43 = vpop.f32.mrb[15].mxu0  ;;  %v2802_v48 = vmax.f32 %v500_v38, 0.0 }
 0x690   :  { %v2797_v44 = vmax.f32 %v492_v40, 0.0  ;;  %v495_v45 = vadd.f32 %v2076_v21, %v494_v43  ;;  %530 = vrot.lane.b32.xlu0 %v514_v42, %s2643_s3 }
 0x691   :  { %v518_v52 = vmul.f32 %v2802_v48, %v2802_v48 }
 0x692   :  { %v2804_v49 = vmax.f32 %v495_v45, 0.0  ;;  %532 = vrot.lane.b32.xlu1 %v515_v47, %s2643_s3  ;;  %v516_v50 = vmul.f32 %v2797_v44, %v2797_v44 }
 0x694   :  { %534 = vrot.lane.b32.xlu0 %v516_v50, %s2643_s3  ;;  %v517_v51 = vmul.f32 %v2804_v49, %v2804_v49 }
 0x696   :  { %536 = vrot.lane.b32.xlu1 %v517_v51, %s2643_s3 }
 0x698   :  { %538 = vrot.lane.b32.xlu0 %v518_v52, %s2643_s3 }
 0x6fe   :  { %v527_v56 = vpop.permute.xlu0 %526 }
 0x6ff   :  { %v547_v57 = vsel %vm111_vm1, %v2781_v28, %v527_v56 }
 0x700   :  { %v529_v58 = vpop.permute.xlu1 %528  ;;  %v554_v60 = vsel %vm220_vm2, %v547_v57, 0.0 }
 0x701   :  { %v548_v59 = vsel %vm111_vm1, %v2785_v32, %v529_v58 }
 0x702   :  { %v555_v61 = vsel %vm220_vm2, %v548_v59, 0.0  ;;  %v531_v62 = vpop.permute.xlu0 %530 }
 0x703   :  { %v556_v63 = vadd.f32 %v555_v61, %v554_v60  ;;  %v549_v1 = vsel %vm111_vm1, %v2783_v31, %v531_v62 }
 0x704   :  { %v557_v2 = vsel %vm220_vm2, %v549_v1, 0.0  ;;  %v533_v3 = vpop.permute.xlu1 %532 }
 0x705   :  { %v558_v4 = vadd.f32 %v557_v2, %v556_v63  ;;  %v550_v5 = vsel %vm111_vm1, %v2789_v34, %v533_v3  ;;  %v2406_v3 = vld [vmem:[#allocation7 + $0x28] sm:$0xff]  }
 0x706   :  { %v559_v6 = vsel %vm220_vm2, %v550_v5, 0.0  ;;  %v535_v7 = vpop.permute.xlu0 %534  ;;  %v2083_v5 = vld [vmem:[#allocation8 + $0x20] ss:$0 sm:$0xff] }
 0x707   :  { %v560_v8 = vadd.f32 %v559_v6, %v558_v4  ;;  %v551_v9 = vsel %vm111_vm1, %v2797_v44, %v535_v7  ;;  %v2407_v4 = vld [vmem:[#allocation7 + $0x38] sm:$0xff]  }
 0x708   :  { %v561_v10 = vsel %vm220_vm2, %v551_v9, 0.0  ;;  %v537_v11 = vpop.permute.xlu1 %536 }
 0x709   :  { %v562_v12 = vadd.f32 %v561_v10, %v560_v8  ;;  %v552_v13 = vsel %vm111_vm1, %v2804_v49, %v537_v11 }
 0x70a   :  { %v563_v14 = vsel %vm220_vm2, %v552_v13, 0.0  ;;  %v539_v15 = vpop.permute.xlu0 %538  ;;  %v2086_v13 = vld [vmem:[#allocation8 + $0x28] ss:$0 sm:$0xff] }
 0x70b   :  { %v564_v16 = vadd.f32 %v563_v14, %v562_v12  ;;  %v553_v17 = vsel %vm111_vm1, %v2802_v48, %v539_v15 }
 0x70c   :  { %v565_v18 = vsel %vm220_vm2, %v553_v17, 0.0 }
 0x70d   :  { %v566_v19 = vadd.f32 %v565_v18, %v564_v16 }
 0x70f   :  { %v567_v20 = vrot.slane %v566_v19, 4 }
 0x711   :  { %v568_v21 = vadd.f32 %v567_v20, %v566_v19 }
 0x713   :  { %v569_v22 = vrot.slane %v568_v21, 2 }
 0x715   :  { %v570_v23 = vadd.f32 %v569_v22, %v568_v21 }
 0x717   :  { %v571_v24 = vrot.slane %v570_v23, 1 }
 0x719   :  { %v572_v25 = vadd.f32 %v571_v24, %v570_v23 }
 0x71b   :  { %v574_v26 = vmul.f32 0.017857144, %v572_v25 }
 0x71d   :  { %v575_v27 = vmul.f32 %v574_v26, %v574_v26  ;;  %v582_v38 = vsub.f32 %v2781_v28, %v574_v26  ;;  %v583_v40 = vsub.f32 %v2785_v32, %v574_v26  ;;  %v584_v45 = vsub.f32 %v2783_v31, %v574_v26 }
 0x71e   :  { %v585_v47 = vsub.f32 %v2789_v34, %v574_v26  ;;  %v586_v56 = vsub.f32 %v2797_v44, %v574_v26  ;;  %v587_v57 = vsub.f32 %v2804_v49, %v574_v26  ;;  %v588_v28 = vsub.f32 %v2802_v48, %v574_v26  ;;  %v96_v49 = vld [vmem:[#allocation2 + $0x40] sm:$0xf]  ;;  %v2405_v48 = vld [vmem:[#allocation7 + $0x20] sm:$0xff]  }
 0x71f   :  { %577 = vrot.lane.b32.xlu1 %v575_v27, %s2643_s3  ;;  %2262 = vmatpush3.bf16.msra.mxu0 %v2405_v48 }
 0x720   :  { %2273 = vmatprep.subr.bf16.mxu0 %v2641_v0 }
 0x791   :  { %v578_v29 = vpop.permute.xlu1 %577 }
 0x792   :  { %v580_v30 = vsub.f32 %v574_v26, %v578_v29 }
 0x794   :  { %v581_v33 = vmax.f32 %v580_v30, 0.0 }
 0x796   :  { %v589_v35 = vadd.f32 1e-05, %v581_v33 }
 0x798   :  { %2424 = vrsqrt.f32 %v589_v35 }
 0x7a2   :  { %v2425_v36 = vpop.eup %2424 }
 0x7a3   :  { %v594_v37 = vrot.slane %v2425_v36, %v2749_v39 }
 0x7a5   :  { %596 = vrot.lane.b32.xlu0 %v594_v37, %s2644_s13 }
 0x817   :  { %v597_v41 = vpop.permute.xlu0 %596 }
 0x818   :  { %v599_v42 = vmul.f32 %v597_v41, %v582_v38  ;;  %v600_v43 = vmul.f32 %v597_v41, %v583_v40  ;;  %v601_v51 = vmul.f32 %v597_v41, %v584_v45  ;;  %v602_v52 = vmul.f32 %v597_v41, %v585_v47  ;;  %v2408_v45 = vld [vmem:[#allocation7 + $0x30] sm:$0xff]  }
 0x819   :  { %v603_v58 = vmul.f32 %v597_v41, %v586_v56  ;;  %v604_v59 = vmul.f32 %v597_v41, %v587_v57  ;;  %v605_v60 = vmul.f32 %v597_v41, %v588_v28 }
 0x81a   :  { %v606_v50 = vpack.c.bf16 %v600_v43, %v599_v42  ;;  %v607_v32 = vpack.c.bf16 %v602_v52, %v601_v51 }
 0x81b   :  { %v608_v31 = vpack.c.bf16 %v604_v59, %v603_v58  ;;  %v609_v34 = vpack.c.bf16 %v605_v60, %v605_v60 }
 0x81c   :  { %2250 = vmatpush3.bf16.msra.mxu1 %v606_v50 }
 0x81d   :  { %2251 = vmatprep.subr.bf16.mxu1 %v2641_v0  ;;  %v616_v44 = vsel %vm614_vm3, %v609_v34, 0 }
 0x820   :  { %2252 = vmatpush3.bf16.msra.mxu1 %v607_v32 }
 0x821   :  { %2253 = vmatprep.subr.bf16.mxu1 %v2641_v0 }
 0x824   :  { %2254 = vmatpush3.bf16.msra.mxu1 %v608_v31 }
 0x825   :  { %2255 = vmatprep.subr.bf16.mxu1 %v2641_v0 }
 0x828   :  { %2256 = vmatpush3.bf16.msra.mxu1 %v616_v44  ;;  %v2100_v44 = vld [vmem:[#allocation8 + $0x30] ss:$0 sm:$0xff] }
 0x829   :  { %2267 = vmatprep.subr.bf16.mxu1 %v2641_v0 }
 0x82b   :  { %2258 = vmatmul.mubr.msk.bf16.vlgmr.msra.gmra.mrb[12].mxu1 %vm610_vm4, %v96_v49 }
 0x82c   :  { %2269 = vmatprep.mubr.msk.bf16.mxu1 %vm2642_vm0, %v2641_v0  ;;  %2268 = vmatpush3.bf16.msra.mxu1 %v2406_v3 }
 0x82d   :  { %2279 = vmatprep.subr.bf16.mxu1 %v2407_v4 }
 0x8fe   :  { %v652_v61 = vpop.f32.mrb[12].mxu1 }
 0x8ff   :  { %v660_v62 = vpack.c.bf16 %v652_v61, %v652_v61  ;;  %v2259_v63 = vpop.f32.mrb[13].mxu1 }
 0x900   :  { %v655_v1 = vpop.f32.mrb[14].mxu1 }
 0x901   :  { %v2260_v2 = vpop.f32.mrb[15].mxu1  ;;  %2264 = vmatmul.mubr.msk.bf16.vlgmr.msra.gmra.mrb[16].mxu0 %vm111_vm1, %v660_v62 }
 0x902   :  { %2275 = vmatprep.mubr.msk.bf16.mxu0 %vm2642_vm0, %v2641_v0  ;;  %2274 = vmatpush3.bf16.msra.mxu0 %v2408_v45 }
 0x9d4   :  { %v709_v6 = vpop.f32.mrb[16].mxu0 }
 0x9d5   :  { %v710_v7 = vadd.f32 %v2083_v5, %v709_v6  ;;  %v2265_v8 = vpop.f32.mrb[17].mxu0 }
 0x9d6   :  { %v712_v9 = vpop.f32.mrb[18].mxu0 }
 0x9d7   :  { %v715_v10 = vmax.f32 %v710_v7, 0.0  ;;  %v2266_v11 = vpop.f32.mrb[19].mxu0 }
 0x9d9   :  { %v718_v12 = vpack.c.bf16 %v715_v10, %v715_v10 }
 0x9db   :  { %2270 = vmatmul.mubr.msk.bf16.vlgmr.msra.gmra.mrb[16].mxu1 %vm111_vm1, %v718_v12 }
 0x9dc   :  { %2281 = vmatprep.mubr.msk.bf16.mxu1 %vm111_vm1, %v606_v50  ;;  %2280 = vmatpush3.bf16.msra.mxu1 %v2407_v4 }
 0x9e3   :  { %2282 = vmatmul.mubr.msk.bf16.vlgmr.msra.gmra.mrb[20].mxu1 %vm111_vm1, %v607_v32 }
 0x9e4   :  { %2285 = vmatprep.mubr.msk.bf16.mxu1 %vm111_vm1, %v608_v31 }
 0x9eb   :  { %2286 = vmatmul.mubr.msk.bf16.gmra.mrb[24].mxu1 %vm111_vm1, %v609_v34  ;;  %v2409_v34 = vld [vmem:[#allocation7 + $0x40] sm:$0xff]  }
 0x9ec   :  { %2291 = vmatprep.mubr.msk.bf16.mxu1 %vm111_vm1, %v2754_v46  ;;  %2299 = vmatprep.subr.bf16.mxu0 %v2409_v34 }
 0xaae   :  { %v767_v14 = vpop.f32.mrb[16].mxu1 }
 0xaaf   :  { %v768_v15 = vadd.f32 %v2086_v13, %v767_v14  ;;  %v2271_v16 = vpop.f32.mrb[17].mxu1 }
 0xab0   :  { %v770_v17 = vpop.f32.mrb[18].mxu1 }
 0xab1   :  { %v773_v18 = vmax.f32 %v768_v15, 0.0  ;;  %v2272_v19 = vpop.f32.mrb[19].mxu1 }
 0xab3   :  { %v774_v20 = vmul.f32 %v773_v18, %v773_v18 }
 0xab5   :  { %776 = vrot.lane.b32.xlu1 %v774_v20, %s2643_s3 }
 0xabe   :  { %v2287_v21 = vpop.f32.mrb[24].mxu1 }
 0xabf   :  { %v2867_v22 = vpop.f32.mrb[25].mxu1 }
 0xac0   :  { %v2288_v23 = vpop.f32.mrb[26].mxu1 }
 0xac1   :  { %v2869_v24 = vpop.f32.mrb[27].mxu1 }
 0xb27   :  { %v777_v25 = vpop.permute.xlu1 %776 }
 0xb28   :  { %v779_v26 = vsel %vm111_vm1, %v773_v18, %v777_v25 }
 0xb29   :  { %v780_v46 = vsel %vm220_vm2, %v779_v26, 0.0 }
 0xb2a   :  { %v781_v27 = vrot.slane %v780_v46, 4 }
 0xb2c   :  { %v782_v29 = vadd.f32 %v781_v27, %v780_v46 }
 0xb2e   :  { %v783_v30 = vrot.slane %v782_v29, 2 }
 0xb30   :  { %v784_v33 = vadd.f32 %v783_v30, %v782_v29 }
 0xb32   :  { %v785_v35 = vrot.slane %v784_v33, 1 }
 0xb34   :  { %v786_v36 = vadd.f32 %v785_v35, %v784_v33 }
 0xb36   :  { %v787_v37 = vmul.f32 0.125, %v786_v36 }
 0xb38   :  { %v788_v38 = vmul.f32 %v787_v37, %v787_v37  ;;  %v795_v51 = vsub.f32 %v773_v18, %v787_v37 }
 0xb3a   :  { %790 = vrot.lane.b32.xlu0 %v788_v38, %s2643_s3 }
 0xbac   :  { %v791_v40 = vpop.permute.xlu0 %790 }
 0xbad   :  { %v793_v41 = vsub.f32 %v787_v37, %v791_v40 }
 0xbaf   :  { %v794_v42 = vmax.f32 %v793_v41, 0.0 }
 0xbb1   :  { %v796_v43 = vadd.f32 1e-05, %v794_v42 }
 0xbb3   :  { %2426 = vrsqrt.f32 %v796_v43 }
 0xbbd   :  { %v2427_v47 = vpop.eup %2426 }
 0xbbe   :  { %v801_v50 = vrot.slane %v2427_v47, %v2749_v39 }
 0xbc0   :  { %803 = vrot.lane.b32.xlu1 %v801_v50, %s2644_s13 }
 0xc32   :  { %v804_v52 = vpop.permute.xlu1 %803 }
 0xc33   :  { %v806_v56 = vmul.f32 %v804_v52, %v795_v51 }
 0xc35   :  { %v809_v57 = vpack.c.bf16 %v806_v56, %v806_v56 }
 0xc37   :  { %2276 = vmatmul.mubr.msk.bf16.vlgmr.msra.gmra.mrb[20].mxu0 %vm111_vm1, %v809_v57 }
 0xc38   :  { %2300 = vmatpush3.bf16.msra.mxu0 %v2409_v34 }
 0xd0a   :  { %v853_v28 = vpop.f32.mrb[20].mxu0 }
 0xd0b   :  { %860 = vrot.lane.b32.xlu0 %v853_v28, %s2644_s13  ;;  %v2277_v32 = vpop.f32.mrb[21].mxu0 }
 0xd0c   :  { %v856_v58 = vpop.f32.mrb[22].mxu0 }
 0xd0d   :  { %v2278_v59 = vpop.f32.mrb[23].mxu0 }
 0xd7d   :  { %v861_v60 = vpop.permute.xlu0 %860 }
 0xd7e   :  { %v863_v31 = vpack.c.bf16 %v861_v60, %v853_v28 }
 0xd80   :  { %2289 = vmatprep.subr.bf16.mxu1 %v863_v31 }
 0xd81   :  { %2290 = vmatpush3.bf16.msra.mxu1 %v863_v31 }
 0xd84   :  { %2292 = vmatmul.mubr.msk.bf16.vlgmr.msra.gmra.mrb[20].mxu1 %vm111_vm1, %v2759_v53 }
 0xd85   :  { %2295 = vmatprep.mubr.msk.bf16.mxu1 %vm111_vm1, %v2761_v54 }
 0xd8c   :  { %2296 = vmatmul.mubr.msk.bf16.gmra.mrb[28].mxu1 %vm111_vm1, %v2768_v55 }
 0xe57   :  { %v2293_v49 = vpop.f32.mrb[20].mxu1 }
 0xe58   :  { %v1018_v48 = vadd.f32 %v2293_v49, %v2100_v44  ;;  %v981_v61 = vpop.f32.mrb[21].mxu1 }
 0xe59   :  { %v1016_v62 = vadd.f32 %v2100_v44, %v981_v61  ;;  %v2294_v63 = vpop.f32.mrb[22].mxu1 }
 0xe5a   :  { %v1019_v1 = vadd.f32 %v2294_v63, %v2100_v44  ;;  %v984_v2 = vpop.f32.mrb[23].mxu1  ;;  %v1025_v4 = vmax.f32 %v1018_v48, 0.0 }
 0xe5b   :  { %v1017_v3 = vadd.f32 %v2100_v44, %v984_v2  ;;  %v1023_v5 = vmax.f32 %v1016_v62, 0.0 }
 0xe5c   :  { %v1026_v53 = vmax.f32 %v1019_v1, 0.0 }
 0xe5d   :  { %v1024_v6 = vmax.f32 %v1017_v3, 0.0 }
 0xe5e   :  { %v1033_v54 = vpack.c.bf16 %v1026_v53, %v1025_v4 }
 0xe5f   :  { %v1032_v7 = vpack.c.bf16 %v1024_v6, %v1023_v5  ;;  %v2297_v8 = vpop.f32.mrb[28].mxu1 }
 0xe60   :  { %v1006_v55 = vadd.f32 %v2297_v8, %v2287_v21  ;;  %v997_v9 = vpop.f32.mrb[29].mxu1  ;;  %v2101_v21 = vld [vmem:[#allocation8 + $0x38] ss:$0 sm:$0xff] }
 0xe61   :  { %v998_v10 = vadd.f32 %v997_v9, %v2867_v22  ;;  %v2298_v11 = vpop.f32.mrb[30].mxu1  ;;  %2301 = vmatprep.mubr.msk.bf16.mxu0 %vm111_vm1, %v1032_v7 }
 0xe62   :  { %v1022_v12 = vadd.f32 %v2100_v44, %v1006_v55  ;;  %v1000_v13 = vpop.f32.mrb[31].mxu1  ;;  %2302 = vmatmul.mubr.msk.bf16.vlgmr.msra.gmra.mrb[24].mxu0 %vm111_vm1, %v1033_v54 }
 0xe63   :  { %v1020_v14 = vadd.f32 %v2100_v44, %v998_v10  ;;  %v1001_v15 = vadd.f32 %v1000_v13, %v2869_v24 }
 0xe64   :  { %v1029_v17 = vmax.f32 %v1022_v12, 0.0 }
 0xe65   :  { %v1021_v16 = vadd.f32 %v2100_v44, %v1001_v15  ;;  %v1027_v18 = vmax.f32 %v1020_v14, 0.0 }
 0xe66   :  { %v1035_v23 = vpack.c.bf16 %v1029_v17, %v1029_v17 }
 0xe67   :  { %v1028_v19 = vmax.f32 %v1021_v16, 0.0 }
 0xe69   :  { %v1034_v20 = vpack.c.bf16 %v1028_v19, %v1027_v18 }
 0xe6b   :  { %2305 = vmatprep.mubr.msk.bf16.mxu0 %vm111_vm1, %v1034_v20 }
 0xe6c   :  { %2306 = vmatmul.mubr.msk.bf16.gmra.mrb[28].mxu0 %vm111_vm1, %v1035_v23 }
 0xf35   :  { %v2303_v22 = vpop.f32.mrb[24].mxu0 }
 0xf36   :  { %v1093_v25 = vpop.f32.mrb[25].mxu0  ;;  %v1102_v26 = vadd.f32 %v2303_v22, %v2101_v21 }
 0xf37   :  { %v1094_v46 = vadd.f32 %v2101_v21, %v1093_v25  ;;  %v2304_v27 = vpop.f32.mrb[26].mxu0 }
 0xf38   :  { %v1096_v29 = vpop.f32.mrb[27].mxu0  ;;  %v1105_v24 = vadd.f32 %v2304_v27, %v2101_v21  ;;  %v2892_v35 = vmax.f32 %v1102_v26, 0.0 }
 0xf39   :  { %v2890_v30 = vmax.f32 %v1094_v46, 0.0  ;;  %v1097_v33 = vadd.f32 %v2101_v21, %v1096_v29 }
 0xf3a   :  { %v2898_v38 = vmax.f32 %v1105_v24, 0.0  ;;  %v1132_v42 = vmul.f32 %v2892_v35, %v2892_v35  ;;  %v2410_v24 = vld [vmem:[#allocation7 + $0x78] sm:$0xff]  }
 0xf3b   :  { %v2894_v36 = vmax.f32 %v1097_v33, 0.0  ;;  %v1130_v37 = vmul.f32 %v2890_v30, %v2890_v30  ;;  %2309 = vmatprep.subr.bf16.mxu0 %v2410_v24 }
 0xf3c   :  { %v1133_v51 = vmul.f32 %v2898_v38, %v2898_v38  ;;  %2310 = vmatpush3.bf16.msra.mxu0 %v2410_v24 }
 0xf3d   :  { %1144 = vrot.lane.b32.xlu1 %v1130_v37, %s2643_s3  ;;  %v1131_v40 = vmul.f32 %v2894_v36, %v2894_v36 }
 0xf3f   :  { %1146 = vrot.lane.b32.xlu0 %v1131_v40, %s2643_s3  ;;  %v2307_v41 = vpop.f32.mrb[28].mxu0  ;;  %v2411_v40 = vld [vmem:[#allocation7 + $0x48] sm:$0xff]  }
 0xf40   :  { %v1109_v43 = vpop.f32.mrb[29].mxu0  ;;  %v1118_v45 = vadd.f32 %v2307_v41, %v2101_v21  ;;  %v2412_v41 = vld [vmem:[#allocation7 + $0x50] sm:$0xff]   ;;  %2319 = vmatprep.subr.bf16.mxu1 %v2411_v40 }
 0xf41   :  { %v1110_v47 = vadd.f32 %v2101_v21, %v1109_v43  ;;  %1148 = vrot.lane.b32.xlu1 %v1132_v42, %s2643_s3  ;;  %v2308_v50 = vpop.f32.mrb[30].mxu0  ;;  %v2413_v42 = vld [vmem:[#allocation2 + $0x20] sm:$0xff]   ;;  %2320 = vmatpush3.bf16.msra.mxu1 %v2411_v40  ;;  %v2414_v43 = vld [vmem:[#allocation2 + $0x28] sm:$0xff]   ;;  %v2113_v40 = vld [vmem:[#allocation8 + $0x40] ss:$0 sm:$0xff] }
 0xf42   :  { %v1112_v52 = vpop.f32.mrb[31].mxu0  ;;  %v2912_v28 = vmax.f32 %v1118_v45, 0.0  ;;  %2323 = vmatprep.mubr.msk.bf16.mxu1 %vm220_vm2, %v2413_v42  ;;  %2321 = vmatprep.subr.bf16.mxu1 %v2412_v41  ;;  %v2418_v42 = vld [vmem:[#allocation7 + $0x60] sm:$0xff]  }
 0xf43   :  { %v2909_v56 = vmax.f32 %v1110_v47, 0.0  ;;  %v1113_v57 = vadd.f32 %v2101_v21, %v1112_v52  ;;  %1150 = vrot.lane.b32.xlu0 %v1133_v51, %s2643_s3 }
 0xf44   :  { %v1136_v60 = vmul.f32 %v2912_v28, %v2912_v28 }
 0xf45   :  { %v2914_v32 = vmax.f32 %v1113_v57, 0.0  ;;  %v1134_v58 = vmul.f32 %v2909_v56, %v2909_v56  ;;  %2322 = vmatpush3.bf16.msra.mxu1 %v2412_v41  ;;  %v2417_v41 = vld [vmem:[#allocation7 + $0x58] sm:$0xff]  }
 0xf46   :  { %2343 = vmatprep.subr.bf16.mxu1 %v2641_v0  ;;  %2331 = vmatprep.subr.bf16.mxu0 %v2417_v41 }
 0xf47   :  { %1152 = vrot.lane.b32.xlu1 %v1134_v58, %s2643_s3  ;;  %v1135_v59 = vmul.f32 %v2914_v32, %v2914_v32 }
 0xf48   :  { %2324 = vmatmul.mubr.msk.bf16.vlgmr.msra.gmra.mrb[32].mxu1 %vm220_vm2, %v2414_v43 }
 0xf49   :  { %1154 = vrot.lane.b32.xlu0 %v1135_v59, %s2643_s3 }
 0xf4b   :  { %1156 = vrot.lane.b32.xlu1 %v1136_v60, %s2643_s3 }
 0xfaf   :  { %v1145_v31 = vpop.permute.xlu1 %1144 }
 0xfb0   :  { %v1165_v34 = vsel %vm111_vm1, %v2890_v30, %v1145_v31 }
 0xfb1   :  { %v1147_v44 = vpop.permute.xlu0 %1146  ;;  %v1172_v48 = vsel %vm220_vm2, %v1165_v34, 0.0 }
 0xfb2   :  { %v1166_v49 = vsel %vm111_vm1, %v2894_v36, %v1147_v44 }
 0xfb3   :  { %v1173_v61 = vsel %vm220_vm2, %v1166_v49, 0.0  ;;  %v1149_v62 = vpop.permute.xlu1 %1148 }
 0xfb4   :  { %v1174_v63 = vadd.f32 %v1173_v61, %v1172_v48  ;;  %v1167_v1 = vsel %vm111_vm1, %v2892_v35, %v1149_v62  ;;  %v2107_v61 = vld [vmem:[#allocation8 + $0x60] ss:$0 sm:$0xff] }
 0xfb5   :  { %v1175_v2 = vsel %vm220_vm2, %v1167_v1, 0.0  ;;  %v1151_v3 = vpop.permute.xlu0 %1150  ;;  %v75_v1 = vld [vmem:[#allocation5 + $0x8] sm:$0xff] }
 0xfb6   :  { %v1176_v4 = vadd.f32 %v1175_v2, %v1174_v63  ;;  %v1168_v53 = vsel %vm111_vm1, %v2898_v38, %v1151_v3 }
 0xfb7   :  { %v1177_v5 = vsel %vm220_vm2, %v1168_v53, 0.0  ;;  %v76_v53 = vld [vmem:[#allocation5 + $0x10] sm:$0xff] }
 0xfb8   :  { %v1178_v54 = vadd.f32 %v1177_v5, %v1176_v4  ;;  %v77_v5 = vld [vmem:[#allocation5 + $0x18] sm:$0xff] }
 0xfb9   :  { %v1153_v6 = vpop.permute.xlu1 %1152 }
 0xfba   :  { %v1169_v7 = vsel %vm111_vm1, %v2909_v56, %v1153_v6 }
 0xfbb   :  { %v1179_v8 = vsel %vm220_vm2, %v1169_v7, 0.0  ;;  %v1155_v55 = vpop.permute.xlu0 %1154 }
 0xfbc   :  { %v1180_v9 = vadd.f32 %v1179_v8, %v1178_v54  ;;  %v1170_v10 = vsel %vm111_vm1, %v2914_v32, %v1155_v55 }
 0xfbd   :  { %v1181_v11 = vsel %vm220_vm2, %v1170_v10, 0.0  ;;  %v1157_v12 = vpop.permute.xlu1 %1156  ;;  %v78_v10 = vld [vmem:[#allocation5 + $0x20] sm:$0xff] }
 0xfbe   :  { %v1182_v13 = vadd.f32 %v1181_v11, %v1180_v9  ;;  %v1171_v14 = vsel %vm111_vm1, %v2912_v28, %v1157_v12 }
 0xfbf   :  { %v1183_v15 = vsel %vm220_vm2, %v1171_v14, 0.0  ;;  %v79_v14 = vld [vmem:[#allocation5 + $0x28] sm:$0xff] }
 0xfc0   :  { %v1184_v16 = vadd.f32 %v1183_v15, %v1182_v13 }
 0xfc2   :  { %v1185_v17 = vrot.slane %v1184_v16, 4 }
 0xfc4   :  { %v1186_v18 = vadd.f32 %v1185_v17, %v1184_v16 }
 0xfc6   :  { %v1187_v19 = vrot.slane %v1186_v18, 2 }
 0xfc8   :  { %v1188_v20 = vadd.f32 %v1187_v19, %v1186_v18 }
 0xfca   :  { %v1189_v23 = vrot.slane %v1188_v20, 1 }
 0xfcc   :  { %v1190_v21 = vadd.f32 %v1189_v23, %v1188_v20  ;;  %v81_v23 = vld [vmem:[#allocation5 + $0x38] sm:$0xff] }
 0xfce   :  { %v1191_v22 = vmul.f32 0.017857144, %v1190_v21  ;;  %v80_v21 = vld [vmem:[#allocation5 + $0x30] sm:$0xff] }
 0xfd0   :  { %v1192_v25 = vmul.f32 %v1191_v22, %v1191_v22  ;;  %v1201_v45 = vsub.f32 %v2892_v35, %v1191_v22  ;;  %v1199_v47 = vsub.f32 %v2890_v30, %v1191_v22  ;;  %v1200_v50 = vsub.f32 %v2894_v36, %v1191_v22 }
 0xfd1   :  { %v1203_v52 = vsub.f32 %v2909_v56, %v1191_v22  ;;  %v1204_v57 = vsub.f32 %v2914_v32, %v1191_v22  ;;  %v1205_v30 = vsub.f32 %v2912_v28, %v1191_v22  ;;  %v2415_v56 = vld [vmem:[#allocation2 + $0x30] sm:$0xff]   ;;  %v2416_v32 = vld [vmem:[#allocation2 + $0x38] ss:$0 sps:$4 sm:$0xff]  }
 0xfd2   :  { %1194 = vrot.lane.b32.xlu0 %v1192_v25, %s2643_s3  ;;  %2327 = vmatprep.mubr.msk.bf16.mxu1 %vm220_vm2, %v2415_v56 }
 0xfd3   :  { %2328 = vmatmul.mubr.msk.bf16.gmra.mrb[36].mxu1 %vm220_vm2, %v2416_v32 }
 0xfd4   :  { %2351 = vmatprep.mubr.msk.bf16.mxu1 %vm2642_vm0, %v2641_v0 }
0x1044   :  { %v1195_v26 = vpop.permute.xlu0 %1194 }
0x1045   :  { %v1197_v46 = vsub.f32 %v1191_v22, %v1195_v26 }
0x1047   :  { %v1198_v27 = vmax.f32 %v1197_v46, 0.0 }
0x1049   :  { %v1206_v29 = vadd.f32 1e-05, %v1198_v27 }
0x104b   :  { %2428 = vrsqrt.f32 %v1206_v29 }
0x1055   :  { %v2429_v33 = vpop.eup %2428 }
0x1056   :  { %v1211_v37 = vrot.slane %v2429_v33, %v2749_v39  ;;  %v1202_v39 = vsub.f32 %v2898_v38, %v1191_v22 }
0x1058   :  { %1213 = vrot.lane.b32.xlu1 %v1211_v37, %s2644_s13  ;;  %v2325_v37 = vpop.f32.mrb[32].mxu1 }
0x1059   :  { %v1550_v43 = vadd.f32 %v2325_v37, %v2113_v40 }
0x105b   :  { %2430 = vtanh.f32 %v1550_v43 }
0x10ca   :  { %v1214_v51 = vpop.permute.xlu1 %1213 }
0x10cb   :  { %v1218_v58 = vmul.f32 %v1214_v51, %v1201_v45  ;;  %v1219_v59 = vmul.f32 %v1214_v51, %v1202_v39  ;;  %v1216_v60 = vmul.f32 %v1214_v51, %v1199_v47  ;;  %v1217_v31 = vmul.f32 %v1214_v51, %v1200_v50  ;;  %v1541_v45 = vpop.f32.mrb[33].mxu1 }
0x10cc   :  { %v1220_v34 = vmul.f32 %v1214_v51, %v1203_v52  ;;  %v1221_v44 = vmul.f32 %v1214_v51, %v1204_v57  ;;  %v1222_v36 = vmul.f32 %v1214_v51, %v1205_v30  ;;  %v1542_v39 = vadd.f32 %v2113_v40, %v1541_v45  ;;  %v2326_v47 = vpop.f32.mrb[34].mxu1  ;;  %v2431_v57 = vpop.eup %2430 }
0x10cd   :  { %v1225_v49 = vpack.c.bf16 %v1217_v31, %v1216_v60  ;;  %v1226_v48 = vpack.c.bf16 %v1219_v59, %v1218_v58  ;;  %v1553_v50 = vadd.f32 %v2326_v47, %v2113_v40  ;;  %v1544_v51 = vpop.f32.mrb[35].mxu1 }
0x10ce   :  { %v1227_v35 = vpack.c.bf16 %v1221_v44, %v1220_v34  ;;  %v1228_v38 = vpack.c.bf16 %v1222_v36, %v1222_v36  ;;  %2432 = vtanh.f32 %v1542_v39  ;;  %v1545_v52 = vadd.f32 %v2113_v40, %v1544_v51  ;;  %v2329_v44 = vpop.f32.mrb[36].mxu1 }
0x10cf   :  { %2311 = vmatprep.mubr.msk.bf16.mxu0 %vm111_vm1, %v1225_v49  ;;  %2434 = vtanh.f32 %v1553_v50  ;;  %v1566_v49 = vadd.f32 %v2329_v44, %v2113_v40 }
0x10d0   :  { %2312 = vmatmul.mubr.msk.bf16.vlgmr.msra.gmra.mrb[32].mxu0 %vm111_vm1, %v1226_v48  ;;  %2436 = vtanh.f32 %v1545_v52  ;;  %v1557_v48 = vpop.f32.mrb[37].mxu1 }
0x10d1   :  { %2315 = vmatprep.mubr.msk.bf16.mxu0 %vm111_vm1, %v1227_v35  ;;  %2332 = vmatpush3.bf16.msra.mxu0 %v2417_v41  ;;  %v1558_v35 = vadd.f32 %v2113_v40, %v1557_v48  ;;  %v2330_v30 = vpop.f32.mrb[38].mxu1  ;;  %2438 = vtanh.f32 %v1566_v49 }
0x10d2   :  { %2333 = vmatprep.subr.bf16.mxu0 %v2418_v42  ;;  %v1560_v36 = vpop.f32.mrb[39].mxu1 }
0x10d3   :  { %2440 = vtanh.f32 %v1558_v35 }
0x10d5   :  { %2334 = vmatpush3.bf16.msra.mxu0 %v2418_v42 }
0x10d6   :  { %2355 = vmatprep.subr.bf16.mxu0 %v2641_v0 }
0x10d8   :  { %2316 = vmatmul.mubr.msk.bf16.gmra.mrb[36].mxu0 %vm111_vm1, %v1228_v38  ;;  %v2433_v58 = vpop.eup %2432  ;;  %v1561_v38 = vadd.f32 %v2113_v40, %v1560_v36 }
0x10d9   :  { %v2435_v59 = vpop.eup %2434 }
0x10da   :  { %v2437_v60 = vpop.eup %2436  ;;  %v1583_v31 = vpack.c.bf16 %v2435_v59, %v2431_v57  ;;  %2442 = vtanh.f32 %v1561_v38 }
0x10db   :  { %v1582_v34 = vpack.c.bf16 %v2437_v60, %v2433_v58  ;;  %v2439_v56 = vpop.eup %2438 }
0x10dd   :  { %2335 = vmatprep.mubr.msk.bf16.mxu0 %vm220_vm2, %v1582_v34  ;;  %v2441_v32 = vpop.eup %2440 }
0x10e0   :  { %2336 = vmatmul.mubr.msk.bf16.vlgmr.msra.gmra.mrb[40].mxu0 %vm220_vm2, %v1583_v31 }
0x11a3   :  { %v2313_v62 = vpop.f32.mrb[32].mxu0 }
0x11a4   :  { %v1286_v63 = vpop.f32.mrb[33].mxu0  ;;  %v2967_v28 = vadd.f32 %v2313_v62, %v2107_v61  ;;  %v1585_v62 = vpack.c.bf16 %v2439_v56, %v2439_v56 }
0x11a5   :  { %v2969_v2 = vadd.f32 %v2107_v61, %v1286_v63  ;;  %v2314_v3 = vpop.f32.mrb[34].mxu0 }
0x11a6   :  { %v1289_v4 = vpop.f32.mrb[35].mxu0  ;;  %v2974_v7 = vadd.f32 %v2314_v3, %v2107_v61  ;;  %v1318_v9 = vadd.f32 %v2967_v28, %v77_v5 }
0x11a7   :  { %v2971_v6 = vadd.f32 %v2107_v61, %v1289_v4  ;;  %v1316_v54 = vadd.f32 %v2969_v2, %v75_v1 }
0x11a8   :  { %v2988_v18 = vmul.f32 10.0, %v1318_v9  ;;  %v1319_v19 = vadd.f32 %v2974_v7, %v78_v10 }
0x11a9   :  { %v2976_v8 = vmul.f32 10.0, %v1316_v54  ;;  %v1317_v55 = vadd.f32 %v2971_v6, %v76_v53 }
0x11aa   :  { %v2997_v46 = vmul.f32 10.0, %v1319_v19 }
0x11ab   :  { %v2317_v11 = vpop.f32.mrb[36].mxu0  ;;  %1330 = vmax.xlane.f32.xlu0 %v2976_v8  ;;  %v2981_v12 = vmul.f32 10.0, %v1317_v55 }
0x11ac   :  { %v1302_v13 = vpop.f32.mrb[37].mxu0  ;;  %v2983_v15 = vadd.f32 %v2317_v11, %v2107_v61 }
0x11ad   :  { %v2985_v16 = vadd.f32 %v2107_v61, %v1302_v13  ;;  %v2318_v17 = vpop.f32.mrb[38].mxu0  ;;  %1332 = vmax.xlane.f32.xlu1 %v2981_v12 }
0x11ae   :  { %v1305_v20 = vpop.f32.mrb[39].mxu0  ;;  %v1322_v27 = vadd.f32 %v2983_v15, %v81_v23 }
0x11af   :  { %v2991_v22 = vadd.f32 %v2107_v61, %v1305_v20  ;;  %1334 = vmax.xlane.f32.xlu0 %v2988_v18  ;;  %v1320_v25 = vadd.f32 %v2985_v16, %v79_v14  ;;  %v2443_v61 = vpop.eup %2442 }
0x11b0   :  { %v3003_v24 = vmul.f32 10.0, %v1322_v27  ;;  %v1584_v63 = vpack.c.bf16 %v2443_v61, %v2441_v32 }
0x11b1   :  { %v2995_v26 = vmul.f32 10.0, %v1320_v25  ;;  %v1321_v29 = vadd.f32 %v2991_v22, %v80_v21 }
0x11b2   :  { %2339 = vmatprep.mubr.msk.bf16.mxu0 %vm220_vm2, %v1584_v63 }
0x11b3   :  { %1338 = vmax.xlane.f32.xlu1 %v2995_v26  ;;  %1336 = vmax.xlane.f32.xlu0 %v2997_v46  ;;  %v3005_v33 = vmul.f32 10.0, %v1321_v29 }
0x11b4   :  { %2340 = vmatmul.mubr.msk.bf16.gmra.mrb[44].mxu0 %vm220_vm2, %v1585_v62 }
0x11b5   :  { %2357 = vmatprep.mubr.msk.bf16.mxu0 %vm2642_vm0, %v2641_v0 }
0x11b7   :  { %1342 = vmax.xlane.f32.xlu1 %v3003_v24  ;;  %1340 = vmax.xlane.f32.xlu0 %v3005_v33 }
0x1238   :  { %v1331_v1 = vpop.xlane.xlu0 %1330 }
0x1239   :  { %v1344_v3 = vsub.f32 %v2976_v8, %v1331_v1 }
0x123a   :  { %v1333_v4 = vpop.xlane.xlu1 %1332 }
0x123b   :  { %v1351_v53 = vmul.f32 1.442695, %v1344_v3  ;;  %v1345_v5 = vsub.f32 %v2981_v12, %v1333_v4  ;;  %v2646_v3 = vmov 0  }
0x123c   :  { %v1335_v54 = vpop.xlane.xlu0 %1334 }
0x123d   :  { %2444 = vpow2.f32 %v1351_v53  ;;  %v1353_v55 = vmul.f32 1.442695, %v1345_v5  ;;  %v1346_v9 = vsub.f32 %v2988_v18, %v1335_v54 }
0x123f   :  { %2446 = vpow2.f32 %v1353_v55  ;;  %v1355_v10 = vmul.f32 1.442695, %v1346_v9 }
0x1240   :  { %v1339_v11 = vpop.xlane.xlu1 %1338  ;;  %v1337_v13 = vpop.xlane.xlu0 %1336 }
0x1241   :  { %2448 = vpow2.f32 %v1355_v10  ;;  %v1348_v14 = vsub.f32 %v2995_v26, %v1339_v11  ;;  %v1347_v17 = vsub.f32 %v2997_v46, %v1337_v13  ;;  %v2124_v13 = vld [vmem:[#allocation8 + $0x48] ss:$0 sm:$0xff] }
0x1243   :  { %v1359_v19 = vmul.f32 1.442695, %v1348_v14  ;;  %v1357_v8 = vmul.f32 1.442695, %v1347_v17 }
0x1244   :  { %v1343_v20 = vpop.xlane.xlu1 %1342  ;;  %v1341_v23 = vpop.xlane.xlu0 %1340 }
0x1245   :  { %2450 = vpow2.f32 %v1359_v19  ;;  %v1350_v12 = vsub.f32 %v3003_v24, %v1343_v20  ;;  %v1349_v21 = vsub.f32 %v3005_v33, %v1341_v23  ;;  %v2645_v24 = vmov 1   ;;  %v3023_v33 = vpop.f32.mrb[40].mxu0 }
0x1246   :  { %2452 = vpow2.f32 %v1357_v8  ;;  %2392 = vset.pattern.permute.xlu1 %v2645_v24  ;;  %2393 = vset.pattern.permute.xlu0 %v2645_v24  ;;  %v3025_v42 = vpop.f32.mrb[41].mxu0  ;;  %v1658_v19 = vadd.f32 %v3023_v33, %v2124_v13 }
0x1247   :  { %v2445_v18 = vpop.eup %2444  ;;  %v1363_v25 = vmul.f32 1.442695, %v1350_v12  ;;  %v1361_v27 = vmul.f32 1.442695, %v1349_v21  ;;  %v3027_v43 = vpop.f32.mrb[42].mxu0  ;;  %v1650_v14 = vadd.f32 %v2124_v13, %v3025_v42 }
0x1248   :  { %1365 = vadd.xlane.f32.xlu0 %v2445_v18  ;;  %v3029_v45 = vpop.f32.mrb[43].mxu0  ;;  %v1661_v8 = vadd.f32 %v3027_v43, %v2124_v13 }
0x1249   :  { %v2447_v29 = vpop.eup %2446  ;;  %2454 = vpow2.f32 %v1363_v25  ;;  %v1653_v17 = vadd.f32 %v2124_v13, %v3029_v45 }
0x124a   :  { %2456 = vpow2.f32 %v1361_v27  ;;  %1367 = vadd.xlane.f32.xlu1 %v2447_v29 }
0x124b   :  { %v2449_v26 = vpop.eup %2448 }
0x124c   :  { %1369 = vadd.xlane.f32.xlu0 %v2449_v26 }
0x124f   :  { %v2451_v46 = vpop.eup %2450 }
0x1250   :  { %v2453_v37 = vpop.eup %2452  ;;  %1373 = vadd.xlane.f32.xlu0 %v2451_v46 }
0x1251   :  { %1371 = vadd.xlane.f32.xlu1 %v2453_v37 }
0x1253   :  { %v2455_v40 = vpop.eup %2454 }
0x1254   :  { %v2457_v41 = vpop.eup %2456  ;;  %1377 = vadd.xlane.f32.xlu0 %v2455_v40 }
0x1255   :  { %1375 = vadd.xlane.f32.xlu1 %v2457_v41 }
0x1287   :  { %v3031_v57 = vpop.f32.mrb[44].mxu0 }
0x1288   :  { %v1665_v59 = vpop.f32.mrb[45].mxu0 }
0x1289   :  { %v2342_v34 = vpop.f32.mrb[46].mxu0  ;;  %v1666_v23 = vadd.f32 %v2124_v13, %v1665_v59 }
0x128a   :  { %v1668_v48 = vpop.f32.mrb[47].mxu0 }
0x12d5   :  { %v1366_v39 = vpop.xlane.xlu0 %1365 }
0x12d6   :  { %2458 = vrcp.f32 %v1366_v39 }
0x12d7   :  { %v1368_v47 = vpop.xlane.xlu1 %1367 }
0x12d8   :  { %2460 = vrcp.f32 %v1368_v47 }
0x12d9   :  { %v1370_v50 = vpop.xlane.xlu0 %1369 }
0x12da   :  { %2462 = vrcp.f32 %v1370_v50 }
0x12dd   :  { %v1374_v51 = vpop.xlane.xlu0 %1373 }
0x12de   :  { %v1372_v52 = vpop.xlane.xlu1 %1371  ;;  %2464 = vrcp.f32 %v1374_v51 }
0x12df   :  { %2466 = vrcp.f32 %v1372_v52 }
0x12e0   :  { %v2459_v58 = vpop.eup %2458 }
0x12e1   :  { %v1378_v60 = vpop.xlane.xlu0 %1377  ;;  %v1386_v31 = vmul.f32 %v2459_v58, %v2445_v18 }
0x12e2   :  { %v2461_v44 = vpop.eup %2460  ;;  %v1376_v49 = vpop.xlane.xlu1 %1375  ;;  %2468 = vrcp.f32 %v1378_v60 }
0x12e3   :  { %2470 = vrcp.f32 %v1376_v49  ;;  %v1686_v35 = vmul.f32 0.5, %v1386_v31  ;;  %2025 = vst [vmem:[#allocation10] sm:$0xff] %v1386_v31  ;;  %v1387_v30 = vmul.f32 %v2461_v44, %v2447_v29  ;;  %v1669_v29 = vadd.f32 %v2124_v13, %v1668_v48 }
0x12e4   :  { %v2463_v36 = vpop.eup %2462  ;;  %2472 = vtanh.f32 %v1650_v14 }
0x12e5   :  { %1736 = vperm.xlu1 %2392, %v1686_v35   ;;  %v1687_v38 = vmul.f32 0.5, %v1387_v30  ;;  %2026 = vst [vmem:[#allocation10 + $0x8] sm:$0xff] %v1387_v30  ;;  %v1388_v56 = vmul.f32 %v2463_v36, %v2449_v26  ;;  %2474 = vtanh.f32 %v1653_v17 }
0x12e6   :  { %2476 = vtanh.f32 %v1658_v19 }
0x12e7   :  { %1740 = vperm.xlu0 %2393, %v1687_v38   ;;  %v1688_v32 = vmul.f32 0.5, %v1388_v56  ;;  %2027 = vst [vmem:[#allocation10 + $0x10] sm:$0xff] %v1388_v56  ;;  %2478 = vtanh.f32 %v1661_v8 }
0x12e8   :  { %v2465_v61 = vpop.eup %2464  ;;  %2480 = vtanh.f32 %v1666_v23  ;;  %v2514_v23 = vld [vmem:[#allocation2 + $0x40] sm:$0xf] }
0x12e9   :  { %v2467_v62 = vpop.eup %2466  ;;  %1744 = vperm.xlu1 %2392, %v1688_v32   ;;  %v1390_v63 = vmul.f32 %v2465_v61, %v2451_v46  ;;  %2482 = vtanh.f32 %v1669_v29 }
0x12ea   :  { %v1389_v1 = vmul.f32 %v2467_v62, %v2453_v37  ;;  %v1674_v37 = vadd.f32 %v3031_v57, %v2124_v13 }
0x12eb   :  { %2395 = vset.pattern.permute.xlu0 %v2646_v3  ;;  %2029 = vst [vmem:[#allocation10 + $0x20] sm:$0xff] %v1390_v63  ;;  %v1690_v10 = vmul.f32 0.5, %v1390_v63 }
0x12ec   :  { %v2469_v4 = vpop.eup %2468  ;;  %v1689_v53 = vmul.f32 0.5, %v1389_v1  ;;  %2028 = vst [vmem:[#allocation10 + $0x18] sm:$0xff] %v1389_v1  ;;  %2484 = vtanh.f32 %v1674_v37 }
0x12ed   :  { %v2471_v5 = vpop.eup %2470  ;;  %v1392_v54 = vmul.f32 %v2469_v4, %v2455_v40 }
0x12ee   :  { %1710 = vperm.xlu0 %2395, %v1689_v53   ;;  %1748 = vperm.xlu1 %2392, %v1689_v53   ;;  %v1391_v55 = vmul.f32 %v2471_v5, %v2457_v41  ;;  %v2473_v20 = vpop.eup %2472 }
0x12ef   :  { %v1692_v9 = vmul.f32 0.5, %v1392_v54  ;;  %2031 = vst [vmem:[#allocation10 + $0x30] sm:$0xff] %v1392_v54  ;;  %v2475_v12 = vpop.eup %2474 }
0x12f0   :  { %2030 = vst [vmem:[#allocation10 + $0x28] sm:$0xff] %v1391_v55  ;;  %v1691_v11 = vmul.f32 0.5, %v1391_v55  ;;  %v2477_v46 = vpop.eup %2476 }
0x12f1   :  { %v2479_v41 = vpop.eup %2478 }
0x12f2   :  { %1752 = vperm.xlu1 %2392, %v1690_v10   ;;  %1725 = vperm.xlu0 %2395, %v1692_v9   ;;  %v2481_v42 = vpop.eup %2480 }
0x12f3   :  { %v2483_v39 = vpop.eup %2482 }
0x12f6   :  { %1756 = vperm.xlu1 %2392, %v1691_v11   ;;  %2396 = vset.pattern.permute.xlu0 %v2645_v24  ;;  %v2485_v51 = vpop.eup %2484 }
0x12fa   :  { %1760 = vperm.xlu1 %2392, %v1692_v9  }
0x12fe   :  { %2394 = vset.pattern.permute.xlu1 %v2646_v3 }
0x12ff   :  { %1695 = vperm.xlu1 %2394, %v1686_v35  }
0x1303   :  { %1700 = vperm.xlu1 %2394, %v1687_v38  }
0x1307   :  { %1705 = vperm.xlu1 %2394, %v1688_v32  }
0x130b   :  { %1715 = vperm.xlu1 %2394, %v1690_v10  }
0x130f   :  { %1720 = vperm.xlu1 %2394, %v1691_v11  }
0x1364   :  { %v1737_v21 = vpop.permute.xlu1 %1736 }
0x1365   :  { %v1763_v18 = vmul.f32 %v2473_v20, %v1737_v21 }
0x1366   :  { %v1741_v25 = vpop.permute.xlu0 %1740 }
0x1367   :  { %v1764_v27 = vmul.f32 %v2475_v12, %v1741_v25  ;;  %1777 = vrot.lane.b32.xlu0 %v1763_v18, %s2644_s13 }
0x1368   :  { %v1745_v26 = vpop.permute.xlu1 %1744 }
0x1369   :  { %1779 = vrot.lane.b32.xlu1 %v1764_v27, %s2644_s13  ;;  %v1765_v40 = vmul.f32 %v2477_v46, %v1745_v26 }
0x136d   :  { %v1749_v24 = vpop.permute.xlu1 %1748  ;;  %1781 = vrot.lane.b32.xlu1 %v1765_v40, %s2644_s13  ;;  %v1711_v31 = vpop.permute.xlu0 %1710 }
0x136e   :  { %v1766_v33 = vmul.f32 %v2479_v41, %v1749_v24  ;;  %v1731_v62 = vmul.f32 %v2479_v41, %v1711_v31 }
0x1370   :  { %1783 = vrot.lane.b32.xlu0 %v1766_v33, %s2644_s13 }
0x1371   :  { %v1753_v43 = vpop.permute.xlu1 %1752  ;;  %v1726_v44 = vpop.permute.xlu0 %1725 }
0x1372   :  { %v1767_v45 = vmul.f32 %v2481_v42, %v1753_v43  ;;  %v1734_v13 = vmul.f32 %v2485_v51, %v1726_v44 }
0x1374   :  { %1785 = vrot.lane.b32.xlu1 %v1767_v45, %s2644_s13 }
0x1375   :  { %v1757_v47 = vpop.permute.xlu1 %1756 }
0x1376   :  { %v1768_v50 = vmul.f32 %v2483_v39, %v1757_v47 }
0x1378   :  { %1787 = vrot.lane.b32.xlu0 %v1768_v50, %s2644_s13 }
0x1379   :  { %v1761_v52 = vpop.permute.xlu1 %1760 }
0x137a   :  { %v1769_v57 = vmul.f32 %v2485_v51, %v1761_v52 }
0x137c   :  { %1789 = vrot.lane.b32.xlu1 %v1769_v57, %s2644_s13 }
0x137e   :  { %v1696_v58 = vpop.permute.xlu1 %1695 }
0x137f   :  { %v1728_v35 = vmul.f32 %v2473_v20, %v1696_v58  ;;  %v2419_v58 = vld [vmem:[#allocation7 + $0x68] sm:$0xff]  }
0x1380   :  { %2356 = vmatpush3.bf16.msra.mxu0 %v2419_v58 }
0x1381   :  { %2367 = vmatprep.subr.bf16.mxu0 %v2641_v0 }
0x1382   :  { %v1701_v59 = vpop.permute.xlu1 %1700 }
0x1383   :  { %v1729_v30 = vmul.f32 %v2475_v12, %v1701_v59 }
0x1386   :  { %v1706_v60 = vpop.permute.xlu1 %1705 }
0x1387   :  { %v1730_v63 = vmul.f32 %v2477_v46, %v1706_v60 }
0x138a   :  { %v1716_v34 = vpop.permute.xlu1 %1715 }
0x138b   :  { %v1732_v54 = vmul.f32 %v2481_v42, %v1716_v34 }
0x138e   :  { %v1721_v49 = vpop.permute.xlu1 %1720 }
0x138f   :  { %v1733_v55 = vmul.f32 %v2483_v39, %v1721_v49 }
0x1397   :  { %1393 = vmax.xlane.f32.xlu0 %v2969_v2 }
0x139b   :  { %1397 = vmax.xlane.f32.xlu0 %v2967_v28 }
0x139f   :  { %1399 = vmax.xlane.f32.xlu0 %v2974_v7 }
0x13a0   :  { %1395 = vmax.xlane.f32.xlu1 %v2971_v6 }
0x13a3   :  { %1403 = vmax.xlane.f32.xlu0 %v2991_v22 }
0x13a4   :  { %1401 = vmax.xlane.f32.xlu1 %v2985_v16 }
0x13a8   :  { %1405 = vmax.xlane.f32.xlu1 %v2983_v15 }
0x13d9   :  { %v1778_v48 = vpop.permute.xlu0 %1777 }
0x13da   :  { %v1798_v38 = vadd.f32 %v1778_v48, %v1728_v35 }
0x13db   :  { %v1780_v36 = vpop.permute.xlu1 %1779 }
0x13dc   :  { %v1799_v56 = vadd.f32 %v1780_v36, %v1729_v30 }
0x13de   :  { %v1805_v32 = vpack.c.bf16 %v1799_v56, %v1798_v38 }
0x13df   :  { %v1782_v61 = vpop.permute.xlu1 %1781 }
0x13e0   :  { %2344 = vmatpush3.bf16.msra.mxu1 %v1805_v32  ;;  %v1800_v3 = vadd.f32 %v1782_v61, %v1730_v63 }
0x13e1   :  { %2345 = vmatprep.subr.bf16.mxu1 %v2641_v0 }
0x13e2   :  { %v1784_v1 = vpop.permute.xlu0 %1783 }
0x13e3   :  { %v1801_v4 = vadd.f32 %v1784_v1, %v1731_v62 }
0x13e5   :  { %v1806_v53 = vpack.c.bf16 %v1801_v4, %v1800_v3 }
0x13e6   :  { %v1786_v5 = vpop.permute.xlu1 %1785 }
0x13e7   :  { %2346 = vmatpush3.bf16.msra.mxu1 %v1806_v53  ;;  %v1802_v10 = vadd.f32 %v1786_v5, %v1732_v54 }
0x13e8   :  { %2347 = vmatprep.subr.bf16.mxu1 %v2641_v0 }
0x13ea   :  { %v1788_v9 = vpop.permute.xlu0 %1787 }
0x13eb   :  { %v1803_v11 = vadd.f32 %v1788_v9, %v1733_v55 }
0x13ed   :  { %v1807_v14 = vpack.c.bf16 %v1803_v11, %v1802_v10  ;;  %v2420_v10 = vld [vmem:[#allocation7 + $0x70] sm:$0xff]   ;;  %v2132_v11 = vld [vmem:[#allocation8 + $0x50] ss:$0 sm:$0xff] }
0x13ee   :  { %v1790_v17 = vpop.permute.xlu1 %1789 }
0x13ef   :  { %v1804_v19 = vadd.f32 %v1790_v17, %v1734_v13  ;;  %2348 = vmatpush3.bf16.msra.mxu1 %v1807_v14 }
0x13f0   :  { %2349 = vmatprep.subr.bf16.mxu1 %v2641_v0 }
0x13f1   :  { %v1808_v8 = vpack.c.bf16 %v1804_v19, %v1804_v19 }
0x13f3   :  { %v1810_v20 = vsel %vm614_vm3, %v1808_v8, 0 }
0x13f4   :  { %2350 = vmatpush3.bf16.msra.mxu1 %v1810_v20 }
0x13f5   :  { %2361 = vmatprep.subr.bf16.mxu1 %v2641_v0 }
0x13f7   :  { %2352 = vmatmul.mubr.msk.bf16.vlgmr.msra.gmra.mrb[40].mxu1 %vm610_vm4, %v2514_v23 }
0x13f8   :  { %2363 = vmatprep.mubr.msk.bf16.mxu1 %vm2642_vm0, %v2641_v0  ;;  %2362 = vmatpush3.bf16.msra.mxu1 %v2420_v10 }
0x1424   :  { %v1394_v12 = vpop.xlane.xlu0 %1393 }
0x1425   :  { %v1407_v21 = vsub.f32 %v2969_v2, %v1394_v12  ;;  %v2421_v12 = vld [vmem:[#allocation7 + $0x80] sm:$0xff]  }
0x1427   :  { %v1414_v18 = vmul.f32 1.442695, %v1407_v21  ;;  %v2135_v21 = vld [vmem:[#allocation8 + $0x58] ss:$0 sm:$0xff] }
0x1428   :  { %v1398_v25 = vpop.xlane.xlu0 %1397 }
0x1429   :  { %2486 = vpow2.f32 %v1414_v18  ;;  %v1409_v27 = vsub.f32 %v2967_v28, %v1398_v25 }
0x142b   :  { %v1418_v29 = vmul.f32 1.442695, %v1409_v27 }
0x142c   :  { %v1400_v26 = vpop.xlane.xlu0 %1399 }
0x142d   :  { %2488 = vpow2.f32 %v1418_v29  ;;  %v1410_v46 = vsub.f32 %v2974_v7, %v1400_v26  ;;  %v1396_v37 = vpop.xlane.xlu1 %1395 }
0x142e   :  { %v1408_v40 = vsub.f32 %v2971_v6, %v1396_v37 }
0x142f   :  { %v1420_v33 = vmul.f32 1.442695, %v1410_v46 }
0x1430   :  { %v1416_v41 = vmul.f32 1.442695, %v1408_v40  ;;  %v1404_v24 = vpop.xlane.xlu0 %1403  ;;  %v2138_v40 = vld [vmem:[#allocation8 + $0x68] ss:$0 sm:$0xff] }
0x1431   :  { %v1412_v42 = vsub.f32 %v2991_v22, %v1404_v24  ;;  %v1402_v43 = vpop.xlane.xlu1 %1401 }
0x1432   :  { %2490 = vpow2.f32 %v1416_v41  ;;  %v1411_v2 = vsub.f32 %v2985_v16, %v1402_v43 }
0x1433   :  { %v2487_v45 = vpop.eup %2486  ;;  %2492 = vpow2.f32 %v1420_v33  ;;  %v1424_v28 = vmul.f32 1.442695, %v1412_v42 }
0x1434   :  { %v1422_v39 = vmul.f32 1.442695, %v1411_v2  ;;  %1428 = vadd.xlane.f32.xlu0 %v2487_v45 }
0x1435   :  { %v1406_v47 = vpop.xlane.xlu1 %1405 }
0x1436   :  { %2494 = vpow2.f32 %v1422_v39  ;;  %v1413_v7 = vsub.f32 %v2983_v15, %v1406_v47 }
0x1437   :  { %v2489_v50 = vpop.eup %2488  ;;  %2496 = vpow2.f32 %v1424_v28 }
0x1438   :  { %v1426_v6 = vmul.f32 1.442695, %v1413_v7  ;;  %1432 = vadd.xlane.f32.xlu0 %v2489_v50 }
0x143a   :  { %2498 = vpow2.f32 %v1426_v6 }
0x143c   :  { %v2491_v51 = vpop.eup %2490 }
0x143d   :  { %1430 = vadd.xlane.f32.xlu1 %v2491_v51  ;;  %v2493_v22 = vpop.eup %2492 }
0x1440   :  { %v2495_v52 = vpop.eup %2494 }
0x1441   :  { %1436 = vadd.xlane.f32.xlu0 %v2495_v52  ;;  %1434 = vadd.xlane.f32.xlu1 %v2493_v22  ;;  %v2497_v16 = vpop.eup %2496 }
0x1444   :  { %v2499_v57 = vpop.eup %2498 }
0x1445   :  { %1440 = vadd.xlane.f32.xlu0 %v2499_v57  ;;  %1438 = vadd.xlane.f32.xlu1 %v2497_v16 }
0x14c1   :  { %v1429_v15 = vpop.xlane.xlu0 %1428 }
0x14c2   :  { %2500 = vrcp.f32 %v1429_v15 }
0x14c5   :  { %v1433_v59 = vpop.xlane.xlu0 %1432 }
0x14c6   :  { %2502 = vrcp.f32 %v1433_v59 }
0x14ca   :  { %v1431_v60 = vpop.xlane.xlu1 %1430  ;;  %v1846_v31 = vpop.f32.mrb[40].mxu1 }
0x14cb   :  { %2504 = vrcp.f32 %v1431_v60  ;;  %v1854_v34 = vpack.c.bf16 %v1846_v31, %v1846_v31  ;;  %v2353_v44 = vpop.f32.mrb[41].mxu1 }
0x14cc   :  { %v2501_v49 = vpop.eup %2500  ;;  %v1849_v48 = vpop.f32.mrb[42].mxu1 }
0x14cd   :  { %v1449_v35 = vmul.f32 %v2501_v49, %v2487_v45  ;;  %v2354_v30 = vpop.f32.mrb[43].mxu1  ;;  %2358 = vmatmul.mubr.msk.bf16.vlgmr.msra.gmra.mrb[48].mxu0 %vm111_vm1, %v1854_v34 }
0x14ce   :  { %v1435_v36 = vpop.xlane.xlu1 %1434  ;;  %v1437_v38 = vpop.xlane.xlu0 %1436  ;;  %2369 = vmatprep.mubr.msk.bf16.mxu0 %vm2642_vm0, %v2641_v0  ;;  %2368 = vmatpush3.bf16.msra.mxu0 %v2421_v12 }
0x14cf   :  { %2032 = vst [vmem:[#allocation10 + $0x38] sm:$0xff] %v1449_v35  ;;  %2506 = vrcp.f32 %v1435_v36 }
0x14d0   :  { %v2503_v56 = vpop.eup %2502  ;;  %2508 = vrcp.f32 %v1437_v38 }
0x14d1   :  { %v1451_v32 = vmul.f32 %v2503_v56, %v2489_v50 }
0x14d2   :  { %v1439_v61 = vpop.xlane.xlu1 %1438  ;;  %v1441_v62 = vpop.xlane.xlu0 %1440 }
0x14d3   :  { %2034 = vst [vmem:[#allocation10 + $0x48] sm:$0xff] %v1451_v32  ;;  %2510 = vrcp.f32 %v1439_v61 }
0x14d4   :  { %2512 = vrcp.f32 %v1441_v62 }
0x14d5   :  { %v2505_v63 = vpop.eup %2504 }
0x14d6   :  { %v1450_v1 = vmul.f32 %v2505_v63, %v2491_v51 }
0x14d8   :  { %2033 = vst [vmem:[#allocation10 + $0x40] sm:$0xff] %v1450_v1 }
0x14d9   :  { %v2507_v3 = vpop.eup %2506 }
0x14da   :  { %v2509_v4 = vpop.eup %2508  ;;  %v1452_v53 = vmul.f32 %v2507_v3, %v2493_v22 }
0x14db   :  { %v1453_v5 = vmul.f32 %v2509_v4, %v2495_v52 }
0x14dc   :  { %2035 = vst [vmem:[#allocation10 + $0x50] sm:$0xff] %v1452_v53 }
0x14dd   :  { %v2511_v54 = vpop.eup %2510  ;;  %2036 = vst [vmem:[#allocation10 + $0x58] sm:$0xff] %v1453_v5 }
0x14de   :  { %v2513_v0 = vpop.eup %2512  ;;  %v1454_v55 = vmul.f32 %v2511_v54, %v2497_v16 }
0x14df   :  { %v1455_v9 = vmul.f32 %v2513_v0, %v2499_v57 }
0x14e0   :  { %2037 = vst [vmem:[#allocation10 + $0x60] sm:$0xff] %v1454_v55 }
0x14e1   :  { %2038 = vst [vmem:[#allocation10 + $0x68] sm:$0xff] %v1455_v9 }
0x15a0   :  { %v1903_v13 = vpop.f32.mrb[48].mxu0 }
0x15a1   :  { %v1904_v14 = vadd.f32 %v2132_v11, %v1903_v13  ;;  %v2359_v17 = vpop.f32.mrb[49].mxu0 }
0x15a2   :  { %v1906_v19 = vpop.f32.mrb[50].mxu0 }
0x15a3   :  { %v1909_v8 = vmax.f32 %v1904_v14, 0.0  ;;  %v2360_v20 = vpop.f32.mrb[51].mxu0 }
0x15a5   :  { %v1912_v23 = vpack.c.bf16 %v1909_v8, %v1909_v8 }
0x15a7   :  { %2364 = vmatmul.mubr.msk.bf16.vlgmr.msra.gmra.mrb[44].mxu1 %vm111_vm1, %v1912_v23 }
0x167a   :  { %v1961_v18 = vpop.f32.mrb[44].mxu1 }
0x167b   :  { %v1962_v25 = vadd.f32 %v2135_v21, %v1961_v18  ;;  %v2365_v27 = vpop.f32.mrb[45].mxu1 }
0x167c   :  { %v1964_v29 = vpop.f32.mrb[46].mxu1 }
0x167d   :  { %v1967_v26 = vmax.f32 %v1962_v25, 0.0  ;;  %v2366_v46 = vpop.f32.mrb[47].mxu1 }
0x167f   :  { %v1970_v37 = vpack.c.bf16 %v1967_v26, %v1967_v26 }
0x1681   :  { %2370 = vmatmul.mubr.msk.bf16.vlgmr.msra.gmra.mrb[52].mxu0 %vm111_vm1, %v1970_v37 }
0x1754   :  { %v2019_v41 = vpop.f32.mrb[52].mxu0 }
0x1755   :  { %v2020_v24 = vadd.f32 %v2138_v40, %v2019_v41  ;;  %v2371_v33 = vpop.f32.mrb[53].mxu0 }
0x1756   :  { %v2022_v42 = vpop.f32.mrb[54].mxu0 }
0x1757   :  { %2039 = vst [vmem:[#allocation10 + $0x70] sm:$0xff] %v2020_v24  ;;  %v2372_v43 = vpop.f32.mrb[55].mxu0 }
0x1758   :  { %2614 = shalt.err (!%p2611_p8)
}
0x1759   :  { %s2615_s19 = scalar_lea.hbm %s3092_s4, 1920 }
0x175a   :  { %p2616_p9 = scmp.ne.s32.totalorder %s3092_s4, %s2615_s19  ;;  %p2619_p10 = scmp.lt.u32.totalorder %s2615_s19, %s3092_s4 }
0x175c   :  { %p2621_p11 = pnand %p2619_p10, %p2616_p9 }
0x175e   :  { %2624 = shalt.err (!%p2621_p11)
}
0x175f   :  { %2051 = dma.vmem_to_hbm [thread:$0]  %s2046_s15, 1920, %s3092_s4, [#allocation4], %s2634_s25, %s2634_s25, %s2635_s26  }
0x1760   :  { %2631 = dma.done.wait [#allocation4], 1920  }
0x1761   :  { %2632 = vsyncadd [#allocation4], 4294965376 }
0x1762   :  { %2055 = vsyncpa [#allocation3], 1 }
0x1763   :  { %2056 = vsyncpa [#allocation6], 1 }
0x1764   :  { %2057 = vsyncpa [#allocation9], 1 }
0x1765   :  { %2058 = vsyncpa [#allocation4], 1 }

</bundles_post_ra>
